<compile_context>
chip_gen: v7x
topology: tpu7x:2x2x1
jax: 0.10.0
libtpu: 0.0.40
codegen_flags: <defaults>
</compile_context>

<pallas_src>
import math
import functools

import jax
import jax.numpy as jnp
from jax import lax
from jax.experimental import pallas as pl
from jax.experimental.pallas import tpu as pltpu


# ----------------------------------------------------------------------------
# Helpers
# ----------------------------------------------------------------------------
def _seq_tile(S, preferred=256):
    """Largest tile <= preferred dividing S (multiple of 8 when possible).
    256 keeps the M dim of the MXU matmuls full on v6e/v7x."""
    for t in (preferred, 128, 64, 32, 16, 8):
        if t <= S and S % t == 0:
            return t
    return S  # full-sequence block (equals full dim -> always layout-legal)


def _resident_spec(shape):
    """Whole-array operand with a constant index map (VMEM-resident across the grid).
    Single-buffered when supported: double-buffering a constant block is pure VMEM waste."""
    idx = lambda *_: (0,) * len(shape)
    try:
        return pl.BlockSpec(shape, idx, pipeline_mode=pl.Buffered(1))
    except (TypeError, AttributeError):   # older JAX without pipeline_mode / Buffered
        return pl.BlockSpec(shape, idx)


# ----------------------------------------------------------------------------
# Kernel 1: packed QKV projection -> bf16 Q (pre-scaled), K, V
# ----------------------------------------------------------------------------
def _qkv_proj_kernel(x_ref, wqkv_ref, bqkv_ref, q_ref, k_ref, v_ref, *, d_model):
    D = d_model
    y = jnp.dot(x_ref[...].astype(jnp.bfloat16), wqkv_ref[...],
                preferred_element_type=jnp.float32) + bqkv_ref[...]   # (tp, 3D) f32
    q_ref[...] = y[:, :D].astype(jnp.bfloat16)        # softmax scale folded into wq/bq
    k_ref[...] = y[:, D:2 * D].astype(jnp.bfloat16)
    v_ref[...] = y[:, 2 * D:].astype(jnp.bfloat16)


# ----------------------------------------------------------------------------
# Kernel 2: flash attention (online softmax over kv blocks) + out_proj + LN1 + FFN + LN2
# ----------------------------------------------------------------------------
def _flash_encoder_kernel(x_ref, q_ref, k_ref, v_ref,
                          wo_ref, bo_ref, w1_ref, b1_ref, w2_ref, b2_ref,
                          g1_ref, be1_ref, g2_ref, be2_ref,
                          out_ref, m_s, l_s, acc_s, *, nhead, eps):
    ki = pl.program_id(2)
    D = x_ref.shape[-1]
    hd = D // nhead

    @pl.when(ki == 0)
    def _init():
        m_s[...] = jnp.full(m_s.shape, -jnp.inf, m_s.dtype)
        l_s[...] = jnp.zeros(l_s.shape, l_s.dtype)
        acc_s[...] = jnp.zeros(acc_s.shape, acc_s.dtype)

    # --- online-softmax update for this kv block, per head (nhead is small & static) ---
    for h in range(nhead):
        lo = h * hd
        qh = q_ref[:, lo:lo + hd]                               # (tq, hd) bf16, pre-scaled
        kh = k_ref[:, lo:lo + hd]                               # (tk, hd) bf16
        vh = v_ref[:, lo:lo + hd]                               # (tk, hd) bf16
        # QK^T: contract the head dim directly -> no explicit K transpose.
        s = lax.dot_general(qh, kh, (((1,), (1,)), ((), ())),
                            preferred_element_type=jnp.float32)  # (tq, tk) f32
        m_prev = m_s[h]                                          # (tq, 1)
        m_new = jnp.maximum(m_prev, jnp.max(s, axis=-1, keepdims=True))
        alpha = jnp.exp(m_prev - m_new)
        p = jnp.exp(s - m_new)
        l_s[h] = alpha * l_s[h] + jnp.sum(p, axis=-1, keepdims=True)
        acc_s[h] = alpha * acc_s[h] + jnp.dot(p.astype(jnp.bfloat16), vh,
                                              preferred_element_type=jnp.float32)
        m_s[h] = m_new

    # --- last kv block: normalize, out_proj, residual+LN1, FFN, residual+LN2 ---
    @pl.when(ki == pl.num_programs(2) - 1)
    def _finalize():
        # Concatenate per-head outputs in registers -> single (tq,D)x(D,D) out_proj matmul.
        ctx = jnp.concatenate(
            [(acc_s[h] / l_s[h]).astype(jnp.bfloat16) for h in range(nhead)],
            axis=-1)                                             # (tq, D) bf16
        attn = jnp.dot(ctx, wo_ref[...],
                       preferred_element_type=jnp.float32) + bo_ref[...]

        # residual + LayerNorm1 (dropout1 = identity)
        src = x_ref[...] + attn
        mu = jnp.mean(src, axis=-1, keepdims=True)
        var = jnp.mean((src - mu) ** 2, axis=-1, keepdims=True)
        src = (src - mu) * lax.rsqrt(var + eps) * g1_ref[...] + be1_ref[...]

        # feed-forward: linear1 -> relu -> linear2 (dropout = identity)
        h1 = jnp.dot(src.astype(jnp.bfloat16), w1_ref[...],
                     preferred_element_type=jnp.float32) + b1_ref[...]
        h1 = jnp.maximum(h1, 0.0)
        src2 = jnp.dot(h1.astype(jnp.bfloat16), w2_ref[...],
                       preferred_element_type=jnp.float32) + b2_ref[...]

        # residual + LayerNorm2 (dropout2 = identity)
        src = src + src2
        mu = jnp.mean(src, axis=-1, keepdims=True)
        var = jnp.mean((src - mu) ** 2, axis=-1, keepdims=True)
        out_ref[...] = ((src - mu) * lax.rsqrt(var + eps)
                        * g2_ref[...] + be2_ref[...]).astype(out_ref.dtype)


# ----------------------------------------------------------------------------
# One-time parameter preparation (hoisted out of the forward pass)
# ----------------------------------------------------------------------------
def prepare_params(params, *, nhead):
    """Transpose, bf16-cast and fold 1/sqrt(head_dim) into the Q projection — once."""
    D = params["out_proj_weight"].shape[0]
    F = params["w1"].shape[0]
    hd = D // nhead
    scale = 1.0 / math.sqrt(hd)
    qkv_scale = jnp.concatenate([jnp.full((D,), scale, jnp.float32),
                                 jnp.ones((2 * D,), jnp.float32)])
    wqkv = params["in_proj_weight"] * qkv_scale[:, None]        # (3D, D)
    bqkv = params["in_proj_bias"] * qkv_scale                   # (3D,)
    f32 = jnp.float32
    return dict(
        wqkv_t=wqkv.T.astype(jnp.bfloat16),                     # (D, 3D) bf16
        bqkv=bqkv.reshape(1, 3 * D).astype(f32),
        wo_t=params["out_proj_weight"].T.astype(jnp.bfloat16),  # (D, D)
        bo=params["out_proj_bias"].reshape(1, D).astype(f32),
        w1_t=params["w1"].T.astype(jnp.bfloat16),               # (D, F)
        b1=params["b1"].reshape(1, F).astype(f32),
        w2_t=params["w2"].T.astype(jnp.bfloat16),               # (F, D)
        b2=params["b2"].reshape(1, D).astype(f32),
        g1=params["gamma1"].reshape(1, D).astype(f32),
        be1=params["beta1"].reshape(1, D).astype(f32),
        g2=params["gamma2"].reshape(1, D).astype(f32),
        be2=params["beta2"].reshape(1, D).astype(f32),
    )


# ----------------------------------------------------------------------------
# Forward wrapper
# ----------------------------------------------------------------------------
def transformer_encoder_layer(src, prep, *, nhead, eps=1e-5):
    """src: (S, B, d_model) float32, PyTorch MultiheadAttention (seq-first) layout."""
    S, B, D = src.shape
    F = prep["w1_t"].shape[1]
    assert D % nhead == 0
    hd = D // nhead

    x = jnp.transpose(src, (1, 0, 2))                           # (B, S, D)

    tp = _seq_tile(S)      # projection row tile
    tq = _seq_tile(S)      # query block
    tk = _seq_tile(S)      # kv block

    # ------------------------- kernel 1: QKV projection -------------------------
    w1_bytes = prep["wqkv_t"].size * 2 + prep["bqkv"].size * 4
    act1_bytes = (tp * D) * (4 + 3 * 2)                         # x f32 + 3 bf16 outputs
    vmem1 = int(min(max(w1_bytes + 4 * act1_bytes + (8 << 20), 32 << 20), 64 << 20))

    q, k, v = pl.pallas_call(
        functools.partial(_qkv_proj_kernel, d_model=D),
        out_shape=[jax.ShapeDtypeStruct((B, S, D), jnp.bfloat16)] * 3,
        grid=(B, S // tp),
        in_specs=[
            pl.BlockSpec((None, tp, D), lambda b, i: (b, i, 0)),
            _resident_spec((D, 3 * D)),
            _resident_spec((1, 3 * D)),
        ],
        out_specs=[pl.BlockSpec((None, tp, D), lambda b, i: (b, i, 0))] * 3,
        compiler_params=pltpu.CompilerParams(
            dimension_semantics=("parallel", "parallel"),
            vmem_limit_bytes=vmem1),
    )(x, prep["wqkv_t"], prep["bqkv"])

    # ----------- kernel 2: flash attention + out_proj + LN1 + FFN + LN2 -----------
    w2_bytes = (D * D + 2 * D * F) * 2 + (6 * D + F) * 4
    act2_bytes = (tq * D) * (4 + 2 + 4) + 2 * (tk * D) * 2       # x, q, out, k, v tiles
    scratch_bytes = nhead * tq * (hd + 2 * 128) * 4
    vmem2 = int(min(max(w2_bytes + 4 * act2_bytes + scratch_bytes + (8 << 20),
                        32 << 20), 64 << 20))

    out = pl.pallas_call(
        functools.partial(_flash_encoder_kernel, nhead=nhead, eps=eps),
        out_shape=jax.ShapeDtypeStruct((B, S, D), src.dtype),
        grid=(B, S // tq, S // tk),
        in_specs=[
            pl.BlockSpec((None, tq, D), lambda b, qi, ki: (b, qi, 0)),   # x (residual)
            pl.BlockSpec((None, tq, D), lambda b, qi, ki: (b, qi, 0)),   # q (pre-scaled)
            pl.BlockSpec((None, tk, D), lambda b, qi, ki: (b, ki, 0)),   # k
            pl.BlockSpec((None, tk, D), lambda b, qi, ki: (b, ki, 0)),   # v
            _resident_spec((D, D)), _resident_spec((1, D)),              # out_proj
            _resident_spec((D, F)), _resident_spec((1, F)),              # linear1
            _resident_spec((F, D)), _resident_spec((1, D)),              # linear2
            _resident_spec((1, D)), _resident_spec((1, D)),              # norm1
            _resident_spec((1, D)), _resident_spec((1, D)),              # norm2
        ],
        out_specs=pl.BlockSpec((None, tq, D), lambda b, qi, ki: (b, qi, 0)),
        scratch_shapes=[
            pltpu.VMEM((nhead, tq, 1), jnp.float32),    # running max m
            pltpu.VMEM((nhead, tq, 1), jnp.float32),    # running denom l
            pltpu.VMEM((nhead, tq, hd), jnp.float32),   # per-head context accumulator
        ],
        compiler_params=pltpu.CompilerParams(
            dimension_semantics=("parallel", "parallel", "arbitrary"),
            vmem_limit_bytes=vmem2),
    )(x, q, k, v,
      prep["wo_t"], prep["bo"], prep["w1_t"], prep["b1"],
      prep["w2_t"], prep["b2"], prep["g1"], prep["be1"], prep["g2"], prep["be2"])

    return jnp.transpose(out, (1, 0, 2))                        # back to (S, B, D)


# ----------------------------------------------------------------------------
# Pure-JAX f32 reference (mirrors PyTorch eval-mode forward)
# ----------------------------------------------------------------------------
def _layernorm(x, g, b, eps=1e-5):
    mu = jnp.mean(x, axis=-1, keepdims=True)
    var = jnp.mean((x - mu) ** 2, axis=-1, keepdims=True)
    return (x - mu) * lax.rsqrt(var + eps) * g + b


def reference_forward(src, params, *, nhead):
    S, B, D = src.shape
    hd = D // nhead
    qkv = src @ params["in_proj_weight"].T + params["in_proj_bias"]
    q, k, v = jnp.split(qkv, 3, axis=-1)

    def to_heads(t):  # (S, B, D) -> (B*nhead, S, hd)
        return t.reshape(S, B * nhead, hd).transpose(1, 0, 2)

    qh, kh, vh = map(to_heads, (q, k, v))
    scores = jnp.einsum('nqd,nkd->nqk', qh * (1.0 / math.sqrt(hd)), kh)
    attn = jax.nn.softmax(scores, axis=-1)
    out = jnp.einsum('nqk,nkd->nqd', attn, vh)
    out = out.transpose(1, 0, 2).reshape(S, B, D)
    src2 = out @ params["out_proj_weight"].T + params["out_proj_bias"]
    x = _layernorm(src + src2, params["gamma1"], params["beta1"])
    h1 = jax.nn.relu(x @ params["w1"].T + params["b1"])
    src2 = h1 @ params["w2"].T + params["b2"]
    x = _layernorm(x + src2, params["gamma2"], params["beta2"])
    return x


# ----------------------------------------------------------------------------
if __name__ == "__main__":
    S, B, D, NHEAD, FF = 8, 2, 32, 4, 64

    key = jax.random.PRNGKey(0)
    ks = jax.random.split(key, 9)

    params = {
        "in_proj_weight": 0.1 * jax.random.normal(ks[0], (3 * D, D), jnp.float32),
        "in_proj_bias":   0.1 * jax.random.normal(ks[1], (3 * D,), jnp.float32),
        "out_proj_weight": 0.1 * jax.random.normal(ks[2], (D, D), jnp.float32),
        "out_proj_bias":   0.1 * jax.random.normal(ks[3], (D,), jnp.float32),
        "w1": 0.1 * jax.random.normal(ks[4], (FF, D), jnp.float32),
        "b1": 0.1 * jax.random.normal(ks[5], (FF,), jnp.float32),
        "w2": 0.1 * jax.random.normal(ks[6], (D, FF), jnp.float32),
        "b2": 0.1 * jax.random.normal(ks[7], (D,), jnp.float32),
        "gamma1": jnp.ones((D,), jnp.float32),
        "beta1":  jnp.zeros((D,), jnp.float32),
        "gamma2": jnp.ones((D,), jnp.float32),
        "beta2":  jnp.zeros((D,), jnp.float32),
    }

    src = jax.random.normal(ks[8], (S, B, D), jnp.float32)

    prep = prepare_params(params, nhead=NHEAD)          # one-time weight prep
    fwd = jax.jit(functools.partial(transformer_encoder_layer, nhead=NHEAD))

    out = jax.block_until_ready(fwd(src, prep))
    ref = jax.block_until_ready(reference_forward(src, params, nhead=NHEAD))

    assert out.shape == (S, B, D)
    # bf16 matmul operands (f32 accumulation) -> looser tolerance vs f32 reference.
    assert jnp.allclose(out, ref, atol=2e-2, rtol=2e-2), "mismatch vs JAX reference"

    print("KERNEL_OK")
</pallas_src>

<mosaic_0001>
module attributes {stable_mosaic.version = 11 : i64} {
  func.func @_qkv_proj_kernel(%arg0: i32, %arg1: i32, %arg2: memref<1x8x32xf32, #tpu.memory_space<vmem>>, %arg3: memref<32x96xbf16, #tpu.memory_space<vmem>>, %arg4: memref<1x96xf32, #tpu.memory_space<vmem>>, %arg5: memref<1x8x32xbf16, #tpu.memory_space<vmem>>, %arg6: memref<1x8x32xbf16, #tpu.memory_space<vmem>>, %arg7: memref<1x8x32xbf16, #tpu.memory_space<vmem>>) attributes {dimension_semantics = [#tpu.dimension_semantics<parallel>, #tpu.dimension_semantics<parallel>], iteration_bounds = array<i64: 2, 1>, scalar_prefetch = 0 : i64, scratch_operands = 0 : i64, tpu.core_type = #tpu.core_type<tc>, window_params = [{transform_indices = @transform_0, window_bounds = array<i64: 1, 8, 32>}, {pipeline_mode = #tpu.pipeline_mode<synchronous>, transform_indices = @transform_1, window_bounds = array<i64: 32, 96>}, {pipeline_mode = #tpu.pipeline_mode<synchronous>, transform_indices = @transform_2, window_bounds = array<i64: 1, 96>}, {transform_indices = @transform_3, window_bounds = array<i64: 1, 8, 32>}, {transform_indices = @transform_4, window_bounds = array<i64: 1, 8, 32>}, {transform_indices = @transform_5, window_bounds = array<i64: 1, 8, 32>}]} {
    %c0 = arith.constant 0 : index
    %c0_0 = arith.constant 0 : index
    %c0_1 = arith.constant 0 : index
    %0 = vector.load %arg2[%c0, %c0_0, %c0_1] : memref<1x8x32xf32, #tpu.memory_space<vmem>>, vector<1x8x32xf32>
    %1 = vector.shape_cast %0 : vector<1x8x32xf32> to vector<8x32xf32>
    %2 = arith.truncf %1 : vector<8x32xf32> to vector<8x32xbf16>
    %c0_2 = arith.constant 0 : index
    %c0_3 = arith.constant 0 : index
    %3 = vector.load %arg3[%c0_2, %c0_3] : memref<32x96xbf16, #tpu.memory_space<vmem>>, vector<32x96xbf16>
    %cst = arith.constant dense<0.000000e+00> : vector<8x96xf32>
    %4 = tpu.matmul %2, %3, %cst {dimension_numbers = #tpu.dot_dimension_numbers<[1], [0], [0], [1], [0, 0, 1, 1], [], []>} : vector<8x32xbf16>, vector<32x96xbf16>, vector<8x96xf32> -> vector<8x96xf32>
    %c0_4 = arith.constant 0 : index
    %c0_5 = arith.constant 0 : index
    %5 = vector.load %arg4[%c0_4, %c0_5] : memref<1x96xf32, #tpu.memory_space<vmem>>, vector<1x96xf32>
    %6 = vector.broadcast %5 : vector<1x96xf32> to vector<8x96xf32>
    %7 = arith.addf %4, %6 : vector<8x96xf32>
    %8 = vector.extract_strided_slice %7 {offsets = [0, 0], sizes = [8, 32], strides = [1, 1]} : vector<8x96xf32> to vector<8x32xf32>
    %9 = arith.truncf %8 : vector<8x32xf32> to vector<8x32xbf16>
    %c0_6 = arith.constant 0 : index
    %c0_7 = arith.constant 0 : index
    %c0_8 = arith.constant 0 : index
    %10 = vector.load %arg5[%c0_6, %c0_7, %c0_8] : memref<1x8x32xbf16, #tpu.memory_space<vmem>>, vector<1x8x32xbf16>
    %11 = vector.shape_cast %10 : vector<1x8x32xbf16> to vector<8x32xbf16>
    %12 = vector.shape_cast %9 : vector<8x32xbf16> to vector<1x8x32xbf16>
    tpu.vector_store %arg5[%c0_6, %c0_7, %c0_8], %12 {strides = array<i32>} : memref<1x8x32xbf16, #tpu.memory_space<vmem>>, vector<1x8x32xbf16>,
    %13 = vector.extract_strided_slice %7 {offsets = [0, 32], sizes = [8, 32], strides = [1, 1]} : vector<8x96xf32> to vector<8x32xf32>
    %14 = arith.truncf %13 : vector<8x32xf32> to vector<8x32xbf16>
    %c0_9 = arith.constant 0 : index
    %c0_10 = arith.constant 0 : index
    %c0_11 = arith.constant 0 : index
    %15 = vector.load %arg6[%c0_9, %c0_10, %c0_11] : memref<1x8x32xbf16, #tpu.memory_space<vmem>>, vector<1x8x32xbf16>
    %16 = vector.shape_cast %15 : vector<1x8x32xbf16> to vector<8x32xbf16>
    %17 = vector.shape_cast %14 : vector<8x32xbf16> to vector<1x8x32xbf16>
    tpu.vector_store %arg6[%c0_9, %c0_10, %c0_11], %17 {strides = array<i32>} : memref<1x8x32xbf16, #tpu.memory_space<vmem>>, vector<1x8x32xbf16>,
    %18 = vector.extract_strided_slice %7 {offsets = [0, 64], sizes = [8, 32], strides = [1, 1]} : vector<8x96xf32> to vector<8x32xf32>
    %19 = arith.truncf %18 : vector<8x32xf32> to vector<8x32xbf16>
    %c0_12 = arith.constant 0 : index
    %c0_13 = arith.constant 0 : index
    %c0_14 = arith.constant 0 : index
    %20 = vector.load %arg7[%c0_12, %c0_13, %c0_14] : memref<1x8x32xbf16, #tpu.memory_space<vmem>>, vector<1x8x32xbf16>
    %21 = vector.shape_cast %20 : vector<1x8x32xbf16> to vector<8x32xbf16>
    %22 = vector.shape_cast %19 : vector<8x32xbf16> to vector<1x8x32xbf16>
    tpu.vector_store %arg7[%c0_12, %c0_13, %c0_14], %22 {strides = array<i32>} : memref<1x8x32xbf16, #tpu.memory_space<vmem>>, vector<1x8x32xbf16>,
    return
  }
  func.func @transform_0(%arg0: i32, %arg1: i32) -> (i32, i32, i32) {
    %c0_i32 = arith.constant 0 : i32
    %c0_i32_0 = arith.constant 0 : i32
    return %arg0, %arg1, %c0_i32 : i32, i32, i32
  }
  func.func @transform_1(%arg0: i32, %arg1: i32) -> (i32, i32) {
    %c0_i32 = arith.constant 0 : i32
    %c0_i32_0 = arith.constant 0 : i32
    %c0_i32_1 = arith.constant 0 : i32
    return %c0_i32, %c0_i32_0 : i32, i32
  }
  func.func @transform_2(%arg0: i32, %arg1: i32) -> (i32, i32) {
    %c0_i32 = arith.constant 0 : i32
    %c0_i32_0 = arith.constant 0 : i32
    %c0_i32_1 = arith.constant 0 : i32
    return %c0_i32, %c0_i32_0 : i32, i32
  }
  func.func @transform_3(%arg0: i32, %arg1: i32) -> (i32, i32, i32) {
    %c0_i32 = arith.constant 0 : i32
    %c0_i32_0 = arith.constant 0 : i32
    return %arg0, %arg1, %c0_i32 : i32, i32, i32
  }
  func.func @transform_4(%arg0: i32, %arg1: i32) -> (i32, i32, i32) {
    %c0_i32 = arith.constant 0 : i32
    %c0_i32_0 = arith.constant 0 : i32
    return %arg0, %arg1, %c0_i32 : i32, i32, i32
  }
  func.func @transform_5(%arg0: i32, %arg1: i32) -> (i32, i32, i32) {
    %c0_i32 = arith.constant 0 : i32
    %c0_i32_0 = arith.constant 0 : i32
    return %arg0, %arg1, %c0_i32 : i32, i32, i32
  }
}

module attributes {stable_mosaic.version = 11 : i64} {
  func.func @_flash_encoder_kernel(%arg0: i32, %arg1: i32, %arg2: i32, %arg3: memref<1x8x32xf32, #tpu.memory_space<vmem>>, %arg4: memref<1x8x32xbf16, #tpu.memory_space<vmem>>, %arg5: memref<1x8x32xbf16, #tpu.memory_space<vmem>>, %arg6: memref<1x8x32xbf16, #tpu.memory_space<vmem>>, %arg7: memref<32x32xbf16, #tpu.memory_space<vmem>>, %arg8: memref<1x32xf32, #tpu.memory_space<vmem>>, %arg9: memref<32x64xbf16, #tpu.memory_space<vmem>>, %arg10: memref<1x64xf32, #tpu.memory_space<vmem>>, %arg11: memref<64x32xbf16, #tpu.memory_space<vmem>>, %arg12: memref<1x32xf32, #tpu.memory_space<vmem>>, %arg13: memref<1x32xf32, #tpu.memory_space<vmem>>, %arg14: memref<1x32xf32, #tpu.memory_space<vmem>>, %arg15: memref<1x32xf32, #tpu.memory_space<vmem>>, %arg16: memref<1x32xf32, #tpu.memory_space<vmem>>, %arg17: memref<1x8x32xf32, #tpu.memory_space<vmem>>, %arg18: memref<4x8x1xf32, #tpu.memory_space<vmem>>, %arg19: memref<4x8x1xf32, #tpu.memory_space<vmem>>, %arg20: memref<4x8x8xf32, #tpu.memory_space<vmem>>) attributes {dimension_semantics = [#tpu.dimension_semantics<parallel>, #tpu.dimension_semantics<parallel>, #tpu.dimension_semantics<arbitrary>], iteration_bounds = array<i64: 2, 1, 1>, scalar_prefetch = 0 : i64, scratch_operands = 3 : i64, tpu.core_type = #tpu.core_type<tc>, window_params = [{transform_indices = @transform_0, window_bounds = array<i64: 1, 8, 32>}, {transform_indices = @transform_1, window_bounds = array<i64: 1, 8, 32>}, {transform_indices = @transform_2, window_bounds = array<i64: 1, 8, 32>}, {transform_indices = @transform_3, window_bounds = array<i64: 1, 8, 32>}, {pipeline_mode = #tpu.pipeline_mode<synchronous>, transform_indices = @transform_4, window_bounds = array<i64: 32, 32>}, {pipeline_mode = #tpu.pipeline_mode<synchronous>, transform_indices = @transform_5, window_bounds = array<i64: 1, 32>}, {pipeline_mode = #tpu.pipeline_mode<synchronous>, transform_indices = @transform_6, window_bounds = array<i64: 32, 64>}, {pipeline_mode = #tpu.pipeline_mode<synchronous>, transform_indices = @transform_7, window_bounds = array<i64: 1, 64>}, {pipeline_mode = #tpu.pipeline_mode<synchronous>, transform_indices = @transform_8, window_bounds = array<i64: 64, 32>}, {pipeline_mode = #tpu.pipeline_mode<synchronous>, transform_indices = @transform_9, window_bounds = array<i64: 1, 32>}, {pipeline_mode = #tpu.pipeline_mode<synchronous>, transform_indices = @transform_10, window_bounds = array<i64: 1, 32>}, {pipeline_mode = #tpu.pipeline_mode<synchronous>, transform_indices = @transform_11, window_bounds = array<i64: 1, 32>}, {pipeline_mode = #tpu.pipeline_mode<synchronous>, transform_indices = @transform_12, window_bounds = array<i64: 1, 32>}, {pipeline_mode = #tpu.pipeline_mode<synchronous>, transform_indices = @transform_13, window_bounds = array<i64: 1, 32>}, {transform_indices = @transform_14, window_bounds = array<i64: 1, 8, 32>}]} {
    %c0_i32 = arith.constant 0 : i32
    %0 = arith.cmpi eq, %arg2, %c0_i32 : i32
    %1 = arith.extui %0 : i1 to i32
    %c0_i32_0 = arith.constant 0 : i32
    %2 = arith.cmpi ne, %1, %c0_i32_0 : i32
    scf.if %2 {
      %cst_119 = arith.constant 0xFF800000 : f32
      %162 = vector.broadcast %cst_119 : f32 to vector<4x8x1xf32>
      %c0_120 = arith.constant 0 : index
      %c0_121 = arith.constant 0 : index
      %c0_122 = arith.constant 0 : index
      %163 = vector.load %arg18[%c0_120, %c0_121, %c0_122] : memref<4x8x1xf32, #tpu.memory_space<vmem>>, vector<4x8x1xf32>
      tpu.vector_store %arg18[%c0_120, %c0_121, %c0_122], %162 {strides = array<i32>} : memref<4x8x1xf32, #tpu.memory_space<vmem>>, vector<4x8x1xf32>,
      %cst_123 = arith.constant 0.000000e+00 : f32
      %164 = vector.broadcast %cst_123 : f32 to vector<4x8x1xf32>
      %c0_124 = arith.constant 0 : index
      %c0_125 = arith.constant 0 : index
      %c0_126 = arith.constant 0 : index
      %165 = vector.load %arg19[%c0_124, %c0_125, %c0_126] : memref<4x8x1xf32, #tpu.memory_space<vmem>>, vector<4x8x1xf32>
      tpu.vector_store %arg19[%c0_124, %c0_125, %c0_126], %164 {strides = array<i32>} : memref<4x8x1xf32, #tpu.memory_space<vmem>>, vector<4x8x1xf32>,
      %cst_127 = arith.constant 0.000000e+00 : f32
      %166 = vector.broadcast %cst_127 : f32 to vector<4x8x8xf32>
      %c0_128 = arith.constant 0 : index
      %c0_129 = arith.constant 0 : index
      %c0_130 = arith.constant 0 : index
      %167 = vector.load %arg20[%c0_128, %c0_129, %c0_130] : memref<4x8x8xf32, #tpu.memory_space<vmem>>, vector<4x8x8xf32>
      tpu.vector_store %arg20[%c0_128, %c0_129, %c0_130], %166 {strides = array<i32>} : memref<4x8x8xf32, #tpu.memory_space<vmem>>, vector<4x8x8xf32>,
    } else {
    }
    %c0 = arith.constant 0 : index
    %c0_1 = arith.constant 0 : index
    %c0_2 = arith.constant 0 : index
    %3 = vector.load %arg4[%c0, %c0_1, %c0_2] : memref<1x8x32xbf16, #tpu.memory_space<vmem>>, vector<1x8x8xbf16>
    %4 = vector.shape_cast %3 : vector<1x8x8xbf16> to vector<8x8xbf16>
    %c0_3 = arith.constant 0 : index
    %c0_4 = arith.constant 0 : index
    %c0_5 = arith.constant 0 : index
    %5 = vector.load %arg5[%c0_3, %c0_4, %c0_5] : memref<1x8x32xbf16, #tpu.memory_space<vmem>>, vector<1x8x8xbf16>
    %6 = vector.shape_cast %5 : vector<1x8x8xbf16> to vector<8x8xbf16>
    %c0_6 = arith.constant 0 : index
    %c0_7 = arith.constant 0 : index
    %c0_8 = arith.constant 0 : index
    %7 = vector.load %arg6[%c0_6, %c0_7, %c0_8] : memref<1x8x32xbf16, #tpu.memory_space<vmem>>, vector<1x8x8xbf16>
    %8 = vector.shape_cast %7 : vector<1x8x8xbf16> to vector<8x8xbf16>
    %cst = arith.constant dense<0.000000e+00> : vector<8x8xf32>
    %9 = tpu.matmul %4, %6, %cst {dimension_numbers = #tpu.dot_dimension_numbers<[1], [1], [0], [0], [0, 0, 1, 0], [], []>} : vector<8x8xbf16>, vector<8x8xbf16>, vector<8x8xf32> -> vector<8x8xf32>
    %c0_9 = arith.constant 0 : index
    %c0_10 = arith.constant 0 : index
    %c0_11 = arith.constant 0 : index
    %10 = vector.load %arg18[%c0_9, %c0_10, %c0_11] : memref<4x8x1xf32, #tpu.memory_space<vmem>>, vector<1x8x1xf32>
    %11 = vector.shape_cast %10 : vector<1x8x1xf32> to vector<8x1xf32>
    %cst_12 = arith.constant dense<0xFF800000> : vector<8xf32>
    %12 = vector.multi_reduction <maximumf>, %9, %cst_12 [1] : vector<8x8xf32> to vector<8xf32>
    %13 = vector.shape_cast %12 : vector<8xf32> to vector<8x1xf32>
    %14 = arith.maximumf %11, %13 : vector<8x1xf32>
    %15 = arith.subf %11, %14 : vector<8x1xf32>
    %16 = math.exp %15 : vector<8x1xf32>
    %17 = vector.broadcast %14 : vector<8x1xf32> to vector<8x8xf32>
    %18 = arith.subf %9, %17 : vector<8x8xf32>
    %19 = math.exp %18 : vector<8x8xf32>
    %c0_13 = arith.constant 0 : index
    %c0_14 = arith.constant 0 : index
    %c0_15 = arith.constant 0 : index
    %20 = vector.load %arg19[%c0_13, %c0_14, %c0_15] : memref<4x8x1xf32, #tpu.memory_space<vmem>>, vector<1x8x1xf32>
    %21 = vector.shape_cast %20 : vector<1x8x1xf32> to vector<8x1xf32>
    %22 = arith.mulf %16, %21 : vector<8x1xf32>
    %cst_16 = arith.constant dense<0.000000e+00> : vector<8xf32>
    %23 = vector.multi_reduction <add>, %19, %cst_16 [1] : vector<8x8xf32> to vector<8xf32>
    %24 = vector.shape_cast %23 : vector<8xf32> to vector<8x1xf32>
    %25 = arith.addf %22, %24 : vector<8x1xf32>
    %c0_17 = arith.constant 0 : index
    %c0_18 = arith.constant 0 : index
    %c0_19 = arith.constant 0 : index
    %26 = vector.load %arg19[%c0_17, %c0_18, %c0_19] : memref<4x8x1xf32, #tpu.memory_space<vmem>>, vector<1x8x1xf32>
    %27 = vector.shape_cast %26 : vector<1x8x1xf32> to vector<8x1xf32>
    %28 = vector.shape_cast %25 : vector<8x1xf32> to vector<1x8x1xf32>
    tpu.vector_store %arg19[%c0_17, %c0_18, %c0_19], %28 {strides = array<i32>} : memref<4x8x1xf32, #tpu.memory_space<vmem>>, vector<1x8x1xf32>,
    %c0_20 = arith.constant 0 : index
    %c0_21 = arith.constant 0 : index
    %c0_22 = arith.constant 0 : index
    %29 = vector.load %arg20[%c0_20, %c0_21, %c0_22] : memref<4x8x8xf32, #tpu.memory_space<vmem>>, vector<1x8x8xf32>
    %30 = vector.shape_cast %29 : vector<1x8x8xf32> to vector<8x8xf32>
    %31 = vector.broadcast %16 : vector<8x1xf32> to vector<8x8xf32>
    %32 = arith.mulf %31, %30 : vector<8x8xf32>
    %33 = arith.truncf %19 : vector<8x8xf32> to vector<8x8xbf16>
    %cst_23 = arith.constant dense<0.000000e+00> : vector<8x8xf32>
    %34 = tpu.matmul %33, %8, %cst_23 {dimension_numbers = #tpu.dot_dimension_numbers<[1], [0], [0], [1], [0, 0, 1, 1], [], []>} : vector<8x8xbf16>, vector<8x8xbf16>, vector<8x8xf32> -> vector<8x8xf32>
    %35 = arith.addf %32, %34 : vector<8x8xf32>
    %c0_24 = arith.constant 0 : index
    %c0_25 = arith.constant 0 : index
    %c0_26 = arith.constant 0 : index
    %36 = vector.load %arg20[%c0_24, %c0_25, %c0_26] : memref<4x8x8xf32, #tpu.memory_space<vmem>>, vector<1x8x8xf32>
    %37 = vector.shape_cast %36 : vector<1x8x8xf32> to vector<8x8xf32>
    %38 = vector.shape_cast %35 : vector<8x8xf32> to vector<1x8x8xf32>
    tpu.vector_store %arg20[%c0_24, %c0_25, %c0_26], %38 {strides = array<i32>} : memref<4x8x8xf32, #tpu.memory_space<vmem>>, vector<1x8x8xf32>,
    %c0_27 = arith.constant 0 : index
    %c0_28 = arith.constant 0 : index
    %c0_29 = arith.constant 0 : index
    %39 = vector.load %arg18[%c0_27, %c0_28, %c0_29] : memref<4x8x1xf32, #tpu.memory_space<vmem>>, vector<1x8x1xf32>
    %40 = vector.shape_cast %39 : vector<1x8x1xf32> to vector<8x1xf32>
    %41 = vector.shape_cast %14 : vector<8x1xf32> to vector<1x8x1xf32>
    tpu.vector_store %arg18[%c0_27, %c0_28, %c0_29], %41 {strides = array<i32>} : memref<4x8x1xf32, #tpu.memory_space<vmem>>, vector<1x8x1xf32>,
    %c0_30 = arith.constant 0 : index
    %c0_31 = arith.constant 0 : index
    %c8 = arith.constant 8 : index
    %42 = vector.load %arg4[%c0_30, %c0_31, %c8] : memref<1x8x32xbf16, #tpu.memory_space<vmem>>, vector<1x8x8xbf16>
    %43 = vector.shape_cast %42 : vector<1x8x8xbf16> to vector<8x8xbf16>
    %c0_32 = arith.constant 0 : index
    %c0_33 = arith.constant 0 : index
    %c8_34 = arith.constant 8 : index
    %44 = vector.load %arg5[%c0_32, %c0_33, %c8_34] : memref<1x8x32xbf16, #tpu.memory_space<vmem>>, vector<1x8x8xbf16>
    %45 = vector.shape_cast %44 : vector<1x8x8xbf16> to vector<8x8xbf16>
    %c0_35 = arith.constant 0 : index
    %c0_36 = arith.constant 0 : index
    %c8_37 = arith.constant 8 : index
    %46 = vector.load %arg6[%c0_35, %c0_36, %c8_37] : memref<1x8x32xbf16, #tpu.memory_space<vmem>>, vector<1x8x8xbf16>
    %47 = vector.shape_cast %46 : vector<1x8x8xbf16> to vector<8x8xbf16>
    %cst_38 = arith.constant dense<0.000000e+00> : vector<8x8xf32>
    %48 = tpu.matmul %43, %45, %cst_38 {dimension_numbers = #tpu.dot_dimension_numbers<[1], [1], [0], [0], [0, 0, 1, 0], [], []>} : vector<8x8xbf16>, vector<8x8xbf16>, vector<8x8xf32> -> vector<8x8xf32>
    %c1 = arith.constant 1 : index
    %c0_39 = arith.constant 0 : index
    %c0_40 = arith.constant 0 : index
    %49 = vector.load %arg18[%c1, %c0_39, %c0_40] : memref<4x8x1xf32, #tpu.memory_space<vmem>>, vector<1x8x1xf32>
    %50 = vector.shape_cast %49 : vector<1x8x1xf32> to vector<8x1xf32>
    %cst_41 = arith.constant dense<0xFF800000> : vector<8xf32>
    %51 = vector.multi_reduction <maximumf>, %48, %cst_41 [1] : vector<8x8xf32> to vector<8xf32>
    %52 = vector.shape_cast %51 : vector<8xf32> to vector<8x1xf32>
    %53 = arith.maximumf %50, %52 : vector<8x1xf32>
    %54 = arith.subf %50, %53 : vector<8x1xf32>
    %55 = math.exp %54 : vector<8x1xf32>
    %56 = vector.broadcast %53 : vector<8x1xf32> to vector<8x8xf32>
    %57 = arith.subf %48, %56 : vector<8x8xf32>
    %58 = math.exp %57 : vector<8x8xf32>
    %c1_42 = arith.constant 1 : index
    %c0_43 = arith.constant 0 : index
    %c0_44 = arith.constant 0 : index
    %59 = vector.load %arg19[%c1_42, %c0_43, %c0_44] : memref<4x8x1xf32, #tpu.memory_space<vmem>>, vector<1x8x1xf32>
    %60 = vector.shape_cast %59 : vector<1x8x1xf32> to vector<8x1xf32>
    %61 = arith.mulf %55, %60 : vector<8x1xf32>
    %cst_45 = arith.constant dense<0.000000e+00> : vector<8xf32>
    %62 = vector.multi_reduction <add>, %58, %cst_45 [1] : vector<8x8xf32> to vector<8xf32>
    %63 = vector.shape_cast %62 : vector<8xf32> to vector<8x1xf32>
    %64 = arith.addf %61, %63 : vector<8x1xf32>
    %c1_46 = arith.constant 1 : index
    %c0_47 = arith.constant 0 : index
    %c0_48 = arith.constant 0 : index
    %65 = vector.load %arg19[%c1_46, %c0_47, %c0_48] : memref<4x8x1xf32, #tpu.memory_space<vmem>>, vector<1x8x1xf32>
    %66 = vector.shape_cast %65 : vector<1x8x1xf32> to vector<8x1xf32>
    %67 = vector.shape_cast %64 : vector<8x1xf32> to vector<1x8x1xf32>
    tpu.vector_store %arg19[%c1_46, %c0_47, %c0_48], %67 {strides = array<i32>} : memref<4x8x1xf32, #tpu.memory_space<vmem>>, vector<1x8x1xf32>,
    %c1_49 = arith.constant 1 : index
    %c0_50 = arith.constant 0 : index
    %c0_51 = arith.constant 0 : index
    %68 = vector.load %arg20[%c1_49, %c0_50, %c0_51] : memref<4x8x8xf32, #tpu.memory_space<vmem>>, vector<1x8x8xf32>
    %69 = vector.shape_cast %68 : vector<1x8x8xf32> to vector<8x8xf32>
    %70 = vector.broadcast %55 : vector<8x1xf32> to vector<8x8xf32>
    %71 = arith.mulf %70, %69 : vector<8x8xf32>
    %72 = arith.truncf %58 : vector<8x8xf32> to vector<8x8xbf16>
    %cst_52 = arith.constant dense<0.000000e+00> : vector<8x8xf32>
    %73 = tpu.matmul %72, %47, %cst_52 {dimension_numbers = #tpu.dot_dimension_numbers<[1], [0], [0], [1], [0, 0, 1, 1], [], []>} : vector<8x8xbf16>, vector<8x8xbf16>, vector<8x8xf32> -> vector<8x8xf32>
    %74 = arith.addf %71, %73 : vector<8x8xf32>
    %c1_53 = arith.constant 1 : index
    %c0_54 = arith.constant 0 : index
    %c0_55 = arith.constant 0 : index
    %75 = vector.load %arg20[%c1_53, %c0_54, %c0_55] : memref<4x8x8xf32, #tpu.memory_space<vmem>>, vector<1x8x8xf32>
    %76 = vector.shape_cast %75 : vector<1x8x8xf32> to vector<8x8xf32>
    %77 = vector.shape_cast %74 : vector<8x8xf32> to vector<1x8x8xf32>
    tpu.vector_store %arg20[%c1_53, %c0_54, %c0_55], %77 {strides = array<i32>} : memref<4x8x8xf32, #tpu.memory_space<vmem>>, vector<1x8x8xf32>,
    %c1_56 = arith.constant 1 : index
    %c0_57 = arith.constant 0 : index
    %c0_58 = arith.constant 0 : index
    %78 = vector.load %arg18[%c1_56, %c0_57, %c0_58] : memref<4x8x1xf32, #tpu.memory_space<vmem>>, vector<1x8x1xf32>
    %79 = vector.shape_cast %78 : vector<1x8x1xf32> to vector<8x1xf32>
    %80 = vector.shape_cast %53 : vector<8x1xf32> to vector<1x8x1xf32>
    tpu.vector_store %arg18[%c1_56, %c0_57, %c0_58], %80 {strides = array<i32>} : memref<4x8x1xf32, #tpu.memory_space<vmem>>, vector<1x8x1xf32>,
    %c0_59 = arith.constant 0 : index
    %c0_60 = arith.constant 0 : index
    %c16 = arith.constant 16 : index
    %81 = vector.load %arg4[%c0_59, %c0_60, %c16] : memref<1x8x32xbf16, #tpu.memory_space<vmem>>, vector<1x8x8xbf16>
    %82 = vector.shape_cast %81 : vector<1x8x8xbf16> to vector<8x8xbf16>
    %c0_61 = arith.constant 0 : index
    %c0_62 = arith.constant 0 : index
    %c16_63 = arith.constant 16 : index
    %83 = vector.load %arg5[%c0_61, %c0_62, %c16_63] : memref<1x8x32xbf16, #tpu.memory_space<vmem>>, vector<1x8x8xbf16>
    %84 = vector.shape_cast %83 : vector<1x8x8xbf16> to vector<8x8xbf16>
    %c0_64 = arith.constant 0 : index
    %c0_65 = arith.constant 0 : index
    %c16_66 = arith.constant 16 : index
    %85 = vector.load %arg6[%c0_64, %c0_65, %c16_66] : memref<1x8x32xbf16, #tpu.memory_space<vmem>>, vector<1x8x8xbf16>
    %86 = vector.shape_cast %85 : vector<1x8x8xbf16> to vector<8x8xbf16>
    %cst_67 = arith.constant dense<0.000000e+00> : vector<8x8xf32>
    %87 = tpu.matmul %82, %84, %cst_67 {dimension_numbers = #tpu.dot_dimension_numbers<[1], [1], [0], [0], [0, 0, 1, 0], [], []>} : vector<8x8xbf16>, vector<8x8xbf16>, vector<8x8xf32> -> vector<8x8xf32>
    %c2 = arith.constant 2 : index
    %c0_68 = arith.constant 0 : index
    %c0_69 = arith.constant 0 : index
    %88 = vector.load %arg18[%c2, %c0_68, %c0_69] : memref<4x8x1xf32, #tpu.memory_space<vmem>>, vector<1x8x1xf32>
    %89 = vector.shape_cast %88 : vector<1x8x1xf32> to vector<8x1xf32>
    %cst_70 = arith.constant dense<0xFF800000> : vector<8xf32>
    %90 = vector.multi_reduction <maximumf>, %87, %cst_70 [1] : vector<8x8xf32> to vector<8xf32>
    %91 = vector.shape_cast %90 : vector<8xf32> to vector<8x1xf32>
    %92 = arith.maximumf %89, %91 : vector<8x1xf32>
    %93 = arith.subf %89, %92 : vector<8x1xf32>
    %94 = math.exp %93 : vector<8x1xf32>
    %95 = vector.broadcast %92 : vector<8x1xf32> to vector<8x8xf32>
    %96 = arith.subf %87, %95 : vector<8x8xf32>
    %97 = math.exp %96 : vector<8x8xf32>
    %c2_71 = arith.constant 2 : index
    %c0_72 = arith.constant 0 : index
    %c0_73 = arith.constant 0 : index
    %98 = vector.load %arg19[%c2_71, %c0_72, %c0_73] : memref<4x8x1xf32, #tpu.memory_space<vmem>>, vector<1x8x1xf32>
    %99 = vector.shape_cast %98 : vector<1x8x1xf32> to vector<8x1xf32>
    %100 = arith.mulf %94, %99 : vector<8x1xf32>
    %cst_74 = arith.constant dense<0.000000e+00> : vector<8xf32>
    %101 = vector.multi_reduction <add>, %97, %cst_74 [1] : vector<8x8xf32> to vector<8xf32>
    %102 = vector.shape_cast %101 : vector<8xf32> to vector<8x1xf32>
    %103 = arith.addf %100, %102 : vector<8x1xf32>
    %c2_75 = arith.constant 2 : index
    %c0_76 = arith.constant 0 : index
    %c0_77 = arith.constant 0 : index
    %104 = vector.load %arg19[%c2_75, %c0_76, %c0_77] : memref<4x8x1xf32, #tpu.memory_space<vmem>>, vector<1x8x1xf32>
    %105 = vector.shape_cast %104 : vector<1x8x1xf32> to vector<8x1xf32>
    %106 = vector.shape_cast %103 : vector<8x1xf32> to vector<1x8x1xf32>
    tpu.vector_store %arg19[%c2_75, %c0_76, %c0_77], %106 {strides = array<i32>} : memref<4x8x1xf32, #tpu.memory_space<vmem>>, vector<1x8x1xf32>,
    %c2_78 = arith.constant 2 : index
    %c0_79 = arith.constant 0 : index
    %c0_80 = arith.constant 0 : index
    %107 = vector.load %arg20[%c2_78, %c0_79, %c0_80] : memref<4x8x8xf32, #tpu.memory_space<vmem>>, vector<1x8x8xf32>
    %108 = vector.shape_cast %107 : vector<1x8x8xf32> to vector<8x8xf32>
    %109 = vector.broadcast %94 : vector<8x1xf32> to vector<8x8xf32>
    %110 = arith.mulf %109, %108 : vector<8x8xf32>
    %111 = arith.truncf %97 : vector<8x8xf32> to vector<8x8xbf16>
    %cst_81 = arith.constant dense<0.000000e+00> : vector<8x8xf32>
    %112 = tpu.matmul %111, %86, %cst_81 {dimension_numbers = #tpu.dot_dimension_numbers<[1], [0], [0], [1], [0, 0, 1, 1], [], []>} : vector<8x8xbf16>, vector<8x8xbf16>, vector<8x8xf32> -> vector<8x8xf32>
    %113 = arith.addf %110, %112 : vector<8x8xf32>
    %c2_82 = arith.constant 2 : index
    %c0_83 = arith.constant 0 : index
    %c0_84 = arith.constant 0 : index
    %114 = vector.load %arg20[%c2_82, %c0_83, %c0_84] : memref<4x8x8xf32, #tpu.memory_space<vmem>>, vector<1x8x8xf32>
    %115 = vector.shape_cast %114 : vector<1x8x8xf32> to vector<8x8xf32>
    %116 = vector.shape_cast %113 : vector<8x8xf32> to vector<1x8x8xf32>
    tpu.vector_store %arg20[%c2_82, %c0_83, %c0_84], %116 {strides = array<i32>} : memref<4x8x8xf32, #tpu.memory_space<vmem>>, vector<1x8x8xf32>,
    %c2_85 = arith.constant 2 : index
    %c0_86 = arith.constant 0 : index
    %c0_87 = arith.constant 0 : index
    %117 = vector.load %arg18[%c2_85, %c0_86, %c0_87] : memref<4x8x1xf32, #tpu.memory_space<vmem>>, vector<1x8x1xf32>
    %118 = vector.shape_cast %117 : vector<1x8x1xf32> to vector<8x1xf32>
    %119 = vector.shape_cast %92 : vector<8x1xf32> to vector<1x8x1xf32>
    tpu.vector_store %arg18[%c2_85, %c0_86, %c0_87], %119 {strides = array<i32>} : memref<4x8x1xf32, #tpu.memory_space<vmem>>, vector<1x8x1xf32>,
    %c0_88 = arith.constant 0 : index
    %c0_89 = arith.constant 0 : index
    %c24 = arith.constant 24 : index
    %120 = vector.load %arg4[%c0_88, %c0_89, %c24] : memref<1x8x32xbf16, #tpu.memory_space<vmem>>, vector<1x8x8xbf16>
    %121 = vector.shape_cast %120 : vector<1x8x8xbf16> to vector<8x8xbf16>
    %c0_90 = arith.constant 0 : index
    %c0_91 = arith.constant 0 : index
    %c24_92 = arith.constant 24 : index
    %122 = vector.load %arg5[%c0_90, %c0_91, %c24_92] : memref<1x8x32xbf16, #tpu.memory_space<vmem>>, vector<1x8x8xbf16>
    %123 = vector.shape_cast %122 : vector<1x8x8xbf16> to vector<8x8xbf16>
    %c0_93 = arith.constant 0 : index
    %c0_94 = arith.constant 0 : index
    %c24_95 = arith.constant 24 : index
    %124 = vector.load %arg6[%c0_93, %c0_94, %c24_95] : memref<1x8x32xbf16, #tpu.memory_space<vmem>>, vector<1x8x8xbf16>
    %125 = vector.shape_cast %124 : vector<1x8x8xbf16> to vector<8x8xbf16>
    %cst_96 = arith.constant dense<0.000000e+00> : vector<8x8xf32>
    %126 = tpu.matmul %121, %123, %cst_96 {dimension_numbers = #tpu.dot_dimension_numbers<[1], [1], [0], [0], [0, 0, 1, 0], [], []>} : vector<8x8xbf16>, vector<8x8xbf16>, vector<8x8xf32> -> vector<8x8xf32>
    %c3 = arith.constant 3 : index
    %c0_97 = arith.constant 0 : index
    %c0_98 = arith.constant 0 : index
    %127 = vector.load %arg18[%c3, %c0_97, %c0_98] : memref<4x8x1xf32, #tpu.memory_space<vmem>>, vector<1x8x1xf32>
    %128 = vector.shape_cast %127 : vector<1x8x1xf32> to vector<8x1xf32>
    %cst_99 = arith.constant dense<0xFF800000> : vector<8xf32>
    %129 = vector.multi_reduction <maximumf>, %126, %cst_99 [1] : vector<8x8xf32> to vector<8xf32>
    %130 = vector.shape_cast %129 : vector<8xf32> to vector<8x1xf32>
    %131 = arith.maximumf %128, %130 : vector<8x1xf32>
    %132 = arith.subf %128, %131 : vector<8x1xf32>
    %133 = math.exp %132 : vector<8x1xf32>
    %134 = vector.broadcast %131 : vector<8x1xf32> to vector<8x8xf32>
    %135 = arith.subf %126, %134 : vector<8x8xf32>
    %136 = math.exp %135 : vector<8x8xf32>
    %c3_100 = arith.constant 3 : index
    %c0_101 = arith.constant 0 : index
    %c0_102 = arith.constant 0 : index
    %137 = vector.load %arg19[%c3_100, %c0_101, %c0_102] : memref<4x8x1xf32, #tpu.memory_space<vmem>>, vector<1x8x1xf32>
    %138 = vector.shape_cast %137 : vector<1x8x1xf32> to vector<8x1xf32>
    %139 = arith.mulf %133, %138 : vector<8x1xf32>
    %cst_103 = arith.constant dense<0.000000e+00> : vector<8xf32>
    %140 = vector.multi_reduction <add>, %136, %cst_103 [1] : vector<8x8xf32> to vector<8xf32>
    %141 = vector.shape_cast %140 : vector<8xf32> to vector<8x1xf32>
    %142 = arith.addf %139, %141 : vector<8x1xf32>
    %c3_104 = arith.constant 3 : index
    %c0_105 = arith.constant 0 : index
    %c0_106 = arith.constant 0 : index
    %143 = vector.load %arg19[%c3_104, %c0_105, %c0_106] : memref<4x8x1xf32, #tpu.memory_space<vmem>>, vector<1x8x1xf32>
    %144 = vector.shape_cast %143 : vector<1x8x1xf32> to vector<8x1xf32>
    %145 = vector.shape_cast %142 : vector<8x1xf32> to vector<1x8x1xf32>
    tpu.vector_store %arg19[%c3_104, %c0_105, %c0_106], %145 {strides = array<i32>} : memref<4x8x1xf32, #tpu.memory_space<vmem>>, vector<1x8x1xf32>,
    %c3_107 = arith.constant 3 : index
    %c0_108 = arith.constant 0 : index
    %c0_109 = arith.constant 0 : index
    %146 = vector.load %arg20[%c3_107, %c0_108, %c0_109] : memref<4x8x8xf32, #tpu.memory_space<vmem>>, vector<1x8x8xf32>
    %147 = vector.shape_cast %146 : vector<1x8x8xf32> to vector<8x8xf32>
    %148 = vector.broadcast %133 : vector<8x1xf32> to vector<8x8xf32>
    %149 = arith.mulf %148, %147 : vector<8x8xf32>
    %150 = arith.truncf %136 : vector<8x8xf32> to vector<8x8xbf16>
    %cst_110 = arith.constant dense<0.000000e+00> : vector<8x8xf32>
    %151 = tpu.matmul %150, %125, %cst_110 {dimension_numbers = #tpu.dot_dimension_numbers<[1], [0], [0], [1], [0, 0, 1, 1], [], []>} : vector<8x8xbf16>, vector<8x8xbf16>, vector<8x8xf32> -> vector<8x8xf32>
    %152 = arith.addf %149, %151 : vector<8x8xf32>
    %c3_111 = arith.constant 3 : index
    %c0_112 = arith.constant 0 : index
    %c0_113 = arith.constant 0 : index
    %153 = vector.load %arg20[%c3_111, %c0_112, %c0_113] : memref<4x8x8xf32, #tpu.memory_space<vmem>>, vector<1x8x8xf32>
    %154 = vector.shape_cast %153 : vector<1x8x8xf32> to vector<8x8xf32>
    %155 = vector.shape_cast %152 : vector<8x8xf32> to vector<1x8x8xf32>
    tpu.vector_store %arg20[%c3_111, %c0_112, %c0_113], %155 {strides = array<i32>} : memref<4x8x8xf32, #tpu.memory_space<vmem>>, vector<1x8x8xf32>,
    %c3_114 = arith.constant 3 : index
    %c0_115 = arith.constant 0 : index
    %c0_116 = arith.constant 0 : index
    %156 = vector.load %arg18[%c3_114, %c0_115, %c0_116] : memref<4x8x1xf32, #tpu.memory_space<vmem>>, vector<1x8x1xf32>
    %157 = vector.shape_cast %156 : vector<1x8x1xf32> to vector<8x1xf32>
    %158 = vector.shape_cast %131 : vector<8x1xf32> to vector<1x8x1xf32>
    tpu.vector_store %arg18[%c3_114, %c0_115, %c0_116], %158 {strides = array<i32>} : memref<4x8x1xf32, #tpu.memory_space<vmem>>, vector<1x8x1xf32>,
    %c0_i32_117 = arith.constant 0 : i32
    %159 = arith.cmpi eq, %arg2, %c0_i32_117 : i32
    %160 = arith.extui %159 : i1 to i32
    %c0_i32_118 = arith.constant 0 : i32
    %161 = arith.cmpi ne, %160, %c0_i32_118 : i32
    scf.if %161 {
      %c0_119 = arith.constant 0 : index
      %c0_120 = arith.constant 0 : index
      %c0_121 = arith.constant 0 : index
      %162 = vector.load %arg20[%c0_119, %c0_120, %c0_121] : memref<4x8x8xf32, #tpu.memory_space<vmem>>, vector<1x8x8xf32>
      %163 = vector.shape_cast %162 : vector<1x8x8xf32> to vector<8x8xf32>
      %c0_122 = arith.constant 0 : index
      %c0_123 = arith.constant 0 : index
      %c0_124 = arith.constant 0 : index
      %164 = vector.load %arg19[%c0_122, %c0_123, %c0_124] : memref<4x8x1xf32, #tpu.memory_space<vmem>>, vector<1x8x1xf32>
      %165 = vector.shape_cast %164 : vector<1x8x1xf32> to vector<8x1xf32>
      %166 = vector.broadcast %165 : vector<8x1xf32> to vector<8x8xf32>
      %167 = arith.divf %163, %166 : vector<8x8xf32>
      %168 = arith.truncf %167 : vector<8x8xf32> to vector<8x8xbf16>
      %c1_125 = arith.constant 1 : index
      %c0_126 = arith.constant 0 : index
      %c0_127 = arith.constant 0 : index
      %169 = vector.load %arg20[%c1_125, %c0_126, %c0_127] : memref<4x8x8xf32, #tpu.memory_space<vmem>>, vector<1x8x8xf32>
      %170 = vector.shape_cast %169 : vector<1x8x8xf32> to vector<8x8xf32>
      %c1_128 = arith.constant 1 : index
      %c0_129 = arith.constant 0 : index
      %c0_130 = arith.constant 0 : index
      %171 = vector.load %arg19[%c1_128, %c0_129, %c0_130] : memref<4x8x1xf32, #tpu.memory_space<vmem>>, vector<1x8x1xf32>
      %172 = vector.shape_cast %171 : vector<1x8x1xf32> to vector<8x1xf32>
      %173 = vector.broadcast %172 : vector<8x1xf32> to vector<8x8xf32>
      %174 = arith.divf %170, %173 : vector<8x8xf32>
      %175 = arith.truncf %174 : vector<8x8xf32> to vector<8x8xbf16>
      %c2_131 = arith.constant 2 : index
      %c0_132 = arith.constant 0 : index
      %c0_133 = arith.constant 0 : index
      %176 = vector.load %arg20[%c2_131, %c0_132, %c0_133] : memref<4x8x8xf32, #tpu.memory_space<vmem>>, vector<1x8x8xf32>
      %177 = vector.shape_cast %176 : vector<1x8x8xf32> to vector<8x8xf32>
      %c2_134 = arith.constant 2 : index
      %c0_135 = arith.constant 0 : index
      %c0_136 = arith.constant 0 : index
      %178 = vector.load %arg19[%c2_134, %c0_135, %c0_136] : memref<4x8x1xf32, #tpu.memory_space<vmem>>, vector<1x8x1xf32>
      %179 = vector.shape_cast %178 : vector<1x8x1xf32> to vector<8x1xf32>
      %180 = vector.broadcast %179 : vector<8x1xf32> to vector<8x8xf32>
      %181 = arith.divf %177, %180 : vector<8x8xf32>
      %182 = arith.truncf %181 : vector<8x8xf32> to vector<8x8xbf16>
      %c3_137 = arith.constant 3 : index
      %c0_138 = arith.constant 0 : index
      %c0_139 = arith.constant 0 : index
      %183 = vector.load %arg20[%c3_137, %c0_138, %c0_139] : memref<4x8x8xf32, #tpu.memory_space<vmem>>, vector<1x8x8xf32>
      %184 = vector.shape_cast %183 : vector<1x8x8xf32> to vector<8x8xf32>
      %c3_140 = arith.constant 3 : index
      %c0_141 = arith.constant 0 : index
      %c0_142 = arith.constant 0 : index
      %185 = vector.load %arg19[%c3_140, %c0_141, %c0_142] : memref<4x8x1xf32, #tpu.memory_space<vmem>>, vector<1x8x1xf32>
      %186 = vector.shape_cast %185 : vector<1x8x1xf32> to vector<8x1xf32>
      %187 = vector.broadcast %186 : vector<8x1xf32> to vector<8x8xf32>
      %188 = arith.divf %184, %187 : vector<8x8xf32>
      %189 = arith.truncf %188 : vector<8x8xf32> to vector<8x8xbf16>
      %190 = tpu.concatenate %168, %175, %182, %189 in 1 : vector<8x8xbf16>, vector<8x8xbf16>, vector<8x8xbf16>, vector<8x8xbf16> -> vector<8x32xbf16>
      %c0_143 = arith.constant 0 : index
      %c0_144 = arith.constant 0 : index
      %191 = vector.load %arg7[%c0_143, %c0_144] : memref<32x32xbf16, #tpu.memory_space<vmem>>, vector<32x32xbf16>
      %cst_145 = arith.constant dense<0.000000e+00> : vector<8x32xf32>
      %192 = tpu.matmul %190, %191, %cst_145 {dimension_numbers = #tpu.dot_dimension_numbers<[1], [0], [0], [1], [0, 0, 1, 1], [], []>} : vector<8x32xbf16>, vector<32x32xbf16>, vector<8x32xf32> -> vector<8x32xf32>
      %c0_146 = arith.constant 0 : index
      %c0_147 = arith.constant 0 : index
      %193 = vector.load %arg8[%c0_146, %c0_147] : memref<1x32xf32, #tpu.memory_space<vmem>>, vector<1x32xf32>
      %194 = vector.broadcast %193 : vector<1x32xf32> to vector<8x32xf32>
      %195 = arith.addf %192, %194 : vector<8x32xf32>
      %c0_148 = arith.constant 0 : index
      %c0_149 = arith.constant 0 : index
      %c0_150 = arith.constant 0 : index
      %196 = vector.load %arg3[%c0_148, %c0_149, %c0_150] : memref<1x8x32xf32, #tpu.memory_space<vmem>>, vector<1x8x32xf32>
      %197 = vector.shape_cast %196 : vector<1x8x32xf32> to vector<8x32xf32>
      %198 = arith.addf %197, %195 : vector<8x32xf32>
      %cst_151 = arith.constant dense<0.000000e+00> : vector<8xf32>
      %199 = vector.multi_reduction <add>, %198, %cst_151 [1] : vector<8x32xf32> to vector<8xf32>
      %200 = vector.shape_cast %199 : vector<8xf32> to vector<8x1xf32>
      %cst_152 = arith.constant 3.200000e+01 : f32
      %201 = vector.broadcast %cst_152 : f32 to vector<8x1xf32>
      %202 = arith.divf %200, %201 : vector<8x1xf32>
      %203 = vector.broadcast %202 : vector<8x1xf32> to vector<8x32xf32>
      %204 = arith.subf %198, %203 : vector<8x32xf32>
      %205 = arith.mulf %204, %204 : vector<8x32xf32>
      %cst_153 = arith.constant dense<0.000000e+00> : vector<8xf32>
      %206 = vector.multi_reduction <add>, %205, %cst_153 [1] : vector<8x32xf32> to vector<8xf32>
      %207 = vector.shape_cast %206 : vector<8xf32> to vector<8x1xf32>
      %cst_154 = arith.constant 3.200000e+01 : f32
      %208 = vector.broadcast %cst_154 : f32 to vector<8x1xf32>
      %209 = arith.divf %207, %208 : vector<8x1xf32>
      %210 = vector.broadcast %202 : vector<8x1xf32> to vector<8x32xf32>
      %211 = arith.subf %198, %210 : vector<8x32xf32>
      %cst_155 = arith.constant 9.99999974E-6 : f32
      %212 = vector.broadcast %cst_155 : f32 to vector<8x1xf32>
      %213 = arith.addf %209, %212 : vector<8x1xf32>
      %214 = math.rsqrt %213 : vector<8x1xf32>
      %215 = vector.broadcast %214 : vector<8x1xf32> to vector<8x32xf32>
      %216 = arith.mulf %211, %215 : vector<8x32xf32>
      %c0_156 = arith.constant 0 : index
      %c0_157 = arith.constant 0 : index
      %217 = vector.load %arg13[%c0_156, %c0_157] : memref<1x32xf32, #tpu.memory_space<vmem>>, vector<1x32xf32>
      %218 = vector.broadcast %217 : vector<1x32xf32> to vector<8x32xf32>
      %219 = arith.mulf %216, %218 : vector<8x32xf32>
      %c0_158 = arith.constant 0 : index
      %c0_159 = arith.constant 0 : index
      %220 = vector.load %arg14[%c0_158, %c0_159] : memref<1x32xf32, #tpu.memory_space<vmem>>, vector<1x32xf32>
      %221 = vector.broadcast %220 : vector<1x32xf32> to vector<8x32xf32>
      %222 = arith.addf %219, %221 : vector<8x32xf32>
      %223 = arith.truncf %222 : vector<8x32xf32> to vector<8x32xbf16>
      %c0_160 = arith.constant 0 : index
      %c0_161 = arith.constant 0 : index
      %224 = vector.load %arg9[%c0_160, %c0_161] : memref<32x64xbf16, #tpu.memory_space<vmem>>, vector<32x64xbf16>
      %cst_162 = arith.constant dense<0.000000e+00> : vector<8x64xf32>
      %225 = tpu.matmul %223, %224, %cst_162 {dimension_numbers = #tpu.dot_dimension_numbers<[1], [0], [0], [1], [0, 0, 1, 1], [], []>} : vector<8x32xbf16>, vector<32x64xbf16>, vector<8x64xf32> -> vector<8x64xf32>
      %c0_163 = arith.constant 0 : index
      %c0_164 = arith.constant 0 : index
      %226 = vector.load %arg10[%c0_163, %c0_164] : memref<1x64xf32, #tpu.memory_space<vmem>>, vector<1x64xf32>
      %227 = vector.broadcast %226 : vector<1x64xf32> to vector<8x64xf32>
      %228 = arith.addf %225, %227 : vector<8x64xf32>
      %cst_165 = arith.constant 0.000000e+00 : f32
      %229 = vector.broadcast %cst_165 : f32 to vector<8x64xf32>
      %230 = arith.maximumf %228, %229 : vector<8x64xf32>
      %231 = arith.truncf %230 : vector<8x64xf32> to vector<8x64xbf16>
      %c0_166 = arith.constant 0 : index
      %c0_167 = arith.constant 0 : index
      %232 = vector.load %arg11[%c0_166, %c0_167] : memref<64x32xbf16, #tpu.memory_space<vmem>>, vector<64x32xbf16>
      %cst_168 = arith.constant dense<0.000000e+00> : vector<8x32xf32>
      %233 = tpu.matmul %231, %232, %cst_168 {dimension_numbers = #tpu.dot_dimension_numbers<[1], [0], [0], [1], [0, 0, 1, 1], [], []>} : vector<8x64xbf16>, vector<64x32xbf16>, vector<8x32xf32> -> vector<8x32xf32>
      %c0_169 = arith.constant 0 : index
      %c0_170 = arith.constant 0 : index
      %234 = vector.load %arg12[%c0_169, %c0_170] : memref<1x32xf32, #tpu.memory_space<vmem>>, vector<1x32xf32>
      %235 = vector.broadcast %234 : vector<1x32xf32> to vector<8x32xf32>
      %236 = arith.addf %233, %235 : vector<8x32xf32>
      %237 = arith.addf %222, %236 : vector<8x32xf32>
      %cst_171 = arith.constant dense<0.000000e+00> : vector<8xf32>
      %238 = vector.multi_reduction <add>, %237, %cst_171 [1] : vector<8x32xf32> to vector<8xf32>
      %239 = vector.shape_cast %238 : vector<8xf32> to vector<8x1xf32>
      %cst_172 = arith.constant 3.200000e+01 : f32
      %240 = vector.broadcast %cst_172 : f32 to vector<8x1xf32>
      %241 = arith.divf %239, %240 : vector<8x1xf32>
      %242 = vector.broadcast %241 : vector<8x1xf32> to vector<8x32xf32>
      %243 = arith.subf %237, %242 : vector<8x32xf32>
      %244 = arith.mulf %243, %243 : vector<8x32xf32>
      %cst_173 = arith.constant dense<0.000000e+00> : vector<8xf32>
      %245 = vector.multi_reduction <add>, %244, %cst_173 [1] : vector<8x32xf32> to vector<8xf32>
      %246 = vector.shape_cast %245 : vector<8xf32> to vector<8x1xf32>
      %cst_174 = arith.constant 3.200000e+01 : f32
      %247 = vector.broadcast %cst_174 : f32 to vector<8x1xf32>
      %248 = arith.divf %246, %247 : vector<8x1xf32>
      %249 = vector.broadcast %241 : vector<8x1xf32> to vector<8x32xf32>
      %250 = arith.subf %237, %249 : vector<8x32xf32>
      %cst_175 = arith.constant 9.99999974E-6 : f32
      %251 = vector.broadcast %cst_175 : f32 to vector<8x1xf32>
      %252 = arith.addf %248, %251 : vector<8x1xf32>
      %253 = math.rsqrt %252 : vector<8x1xf32>
      %254 = vector.broadcast %253 : vector<8x1xf32> to vector<8x32xf32>
      %255 = arith.mulf %250, %254 : vector<8x32xf32>
      %c0_176 = arith.constant 0 : index
      %c0_177 = arith.constant 0 : index
      %256 = vector.load %arg15[%c0_176, %c0_177] : memref<1x32xf32, #tpu.memory_space<vmem>>, vector<1x32xf32>
      %257 = vector.broadcast %256 : vector<1x32xf32> to vector<8x32xf32>
      %258 = arith.mulf %255, %257 : vector<8x32xf32>
      %c0_178 = arith.constant 0 : index
      %c0_179 = arith.constant 0 : index
      %259 = vector.load %arg16[%c0_178, %c0_179] : memref<1x32xf32, #tpu.memory_space<vmem>>, vector<1x32xf32>
      %260 = vector.broadcast %259 : vector<1x32xf32> to vector<8x32xf32>
      %261 = arith.addf %258, %260 : vector<8x32xf32>
      %c0_180 = arith.constant 0 : index
      %c0_181 = arith.constant 0 : index
      %c0_182 = arith.constant 0 : index
      %262 = vector.load %arg17[%c0_180, %c0_181, %c0_182] : memref<1x8x32xf32, #tpu.memory_space<vmem>>, vector<1x8x32xf32>
      %263 = vector.shape_cast %262 : vector<1x8x32xf32> to vector<8x32xf32>
      %264 = vector.shape_cast %261 : vector<8x32xf32> to vector<1x8x32xf32>
      tpu.vector_store %arg17[%c0_180, %c0_181, %c0_182], %264 {strides = array<i32>} : memref<1x8x32xf32, #tpu.memory_space<vmem>>, vector<1x8x32xf32>,
    } else {
    }
    return
  }
  func.func @transform_0(%arg0: i32, %arg1: i32, %arg2: i32) -> (i32, i32, i32) {
    %c0_i32 = arith.constant 0 : i32
    %c0_i32_0 = arith.constant 0 : i32
    return %arg0, %arg1, %c0_i32 : i32, i32, i32
  }
  func.func @transform_1(%arg0: i32, %arg1: i32, %arg2: i32) -> (i32, i32, i32) {
    %c0_i32 = arith.constant 0 : i32
    %c0_i32_0 = arith.constant 0 : i32
    return %arg0, %arg1, %c0_i32 : i32, i32, i32
  }
  func.func @transform_2(%arg0: i32, %arg1: i32, %arg2: i32) -> (i32, i32, i32) {
    %c0_i32 = arith.constant 0 : i32
    %c0_i32_0 = arith.constant 0 : i32
    return %arg0, %arg2, %c0_i32 : i32, i32, i32
  }
  func.func @transform_3(%arg0: i32, %arg1: i32, %arg2: i32) -> (i32, i32, i32) {
    %c0_i32 = arith.constant 0 : i32
    %c0_i32_0 = arith.constant 0 : i32
    return %arg0, %arg2, %c0_i32 : i32, i32, i32
  }
  func.func @transform_4(%arg0: i32, %arg1: i32, %arg2: i32) -> (i32, i32) {
    %c0_i32 = arith.constant 0 : i32
    %c0_i32_0 = arith.constant 0 : i32
    %c0_i32_1 = arith.constant 0 : i32
    return %c0_i32, %c0_i32_0 : i32, i32
  }
  func.func @transform_5(%arg0: i32, %arg1: i32, %arg2: i32) -> (i32, i32) {
    %c0_i32 = arith.constant 0 : i32
    %c0_i32_0 = arith.constant 0 : i32
    %c0_i32_1 = arith.constant 0 : i32
    return %c0_i32, %c0_i32_0 : i32, i32
  }
  func.func @transform_6(%arg0: i32, %arg1: i32, %arg2: i32) -> (i32, i32) {
    %c0_i32 = arith.constant 0 : i32
    %c0_i32_0 = arith.constant 0 : i32
    %c0_i32_1 = arith.constant 0 : i32
    return %c0_i32, %c0_i32_0 : i32, i32
  }
  func.func @transform_7(%arg0: i32, %arg1: i32, %arg2: i32) -> (i32, i32) {
    %c0_i32 = arith.constant 0 : i32
    %c0_i32_0 = arith.constant 0 : i32
    %c0_i32_1 = arith.constant 0 : i32
    return %c0_i32, %c0_i32_0 : i32, i32
  }
  func.func @transform_8(%arg0: i32, %arg1: i32, %arg2: i32) -> (i32, i32) {
    %c0_i32 = arith.constant 0 : i32
    %c0_i32_0 = arith.constant 0 : i32
    %c0_i32_1 = arith.constant 0 : i32
    return %c0_i32, %c0_i32_0 : i32, i32
  }
  func.func @transform_9(%arg0: i32, %arg1: i32, %arg2: i32) -> (i32, i32) {
    %c0_i32 = arith.constant 0 : i32
    %c0_i32_0 = arith.constant 0 : i32
    %c0_i32_1 = arith.constant 0 : i32
    return %c0_i32, %c0_i32_0 : i32, i32
  }
  func.func @transform_10(%arg0: i32, %arg1: i32, %arg2: i32) -> (i32, i32) {
    %c0_i32 = arith.constant 0 : i32
    %c0_i32_0 = arith.constant 0 : i32
    %c0_i32_1 = arith.constant 0 : i32
    return %c0_i32, %c0_i32_0 : i32, i32
  }
  func.func @transform_11(%arg0: i32, %arg1: i32, %arg2: i32) -> (i32, i32) {
    %c0_i32 = arith.constant 0 : i32
    %c0_i32_0 = arith.constant 0 : i32
    %c0_i32_1 = arith.constant 0 : i32
    return %c0_i32, %c0_i32_0 : i32, i32
  }
  func.func @transform_12(%arg0: i32, %arg1: i32, %arg2: i32) -> (i32, i32) {
    %c0_i32 = arith.constant 0 : i32
    %c0_i32_0 = arith.constant 0 : i32
    %c0_i32_1 = arith.constant 0 : i32
    return %c0_i32, %c0_i32_0 : i32, i32
  }
  func.func @transform_13(%arg0: i32, %arg1: i32, %arg2: i32) -> (i32, i32) {
    %c0_i32 = arith.constant 0 : i32
    %c0_i32_0 = arith.constant 0 : i32
    %c0_i32_1 = arith.constant 0 : i32
    return %c0_i32, %c0_i32_0 : i32, i32
  }
  func.func @transform_14(%arg0: i32, %arg1: i32, %arg2: i32) -> (i32, i32, i32) {
    %c0_i32 = arith.constant 0 : i32
    %c0_i32_0 = arith.constant 0 : i32
    return %arg0, %arg1, %c0_i32 : i32, i32, i32
  }
}

</mosaic_0001>

<bundles_post_ra>
// kernel: transformer_encoder_layer.2
= control target key start
LH: loop header
LB: loop body
LE: loop exit
PB: predicated region body
PF: predicated region fallthrough
CT: control target
= control target key end

     0   :  { %s644_s18 = smov 0   ;;  %s646_s19 = smov 0   ;;  %s692_s0 = inlined_call_operand.vmem [shape: f32[2,8,32], index: 0, kind: input, shape index: {}]   ;;  %s693_s1 = inlined_call_operand.vmem [shape: bf16[32,96], index: 1, kind: input, shape index: {}]   ;;  %s694_s2 = inlined_call_operand.vmem [shape: f32[1,96], index: 2, kind: input, shape index: {}]   ;;  %s695_s3 = inlined_call_operand.vmem [shape: bf16[2,8,32], index: 3, kind: output, shape index: {0}]   ;;  %s696_s4 = inlined_call_operand.vmem [shape: bf16[2,8,32], index: 4, kind: output, shape index: {1}]   ;;  %s697_s5 = inlined_call_operand.vmem [shape: bf16[2,8,32], index: 5, kind: output, shape index: {2}]  }
   0x1   :  { %s648_s20 = smov 0  }
   0x2 LB: > { %s28_s21 = sadd.s32 1, %s604_s19  ;;  %p532_p0 = scmp.ge.s32.totalorder %s608_s20, 1  ;;  %s608_s20 = sphi %s648_s20, %s16_s20   ;;  %s604_s19 = sphi %s646_s19, %s699_s19   ;;  %s600_s18 = sphi %s644_s18, %s698_s18  }
   0x3   : > { %p30_p1 = scmp.ge.s32.totalorder %s28_s21, 2  ;;  %p214_p2 = scmp.lt.s32.totalorder %s608_s20, 3 }
   0x5   : > { %s701_s21 = smov (%p30_p1, %s28_s21), 0  ;;  %p215_p3 = pnand %p532_p0, %p214_p2 }
   0x6   : > { %v584_v0 = vld [vmem:[%s693_s1] sm:$0xff] (!%p215_p3)   ;;  %v610_v1 = vmov (!%p215_p3), 0.0   ;;  %v585_v2 = vld [vmem:[%s693_s1 + $0x8] sm:$0xff] (!%p215_p3)   ;;  %vm611_vm0 = vmmov (!%p215_p3), 0   ;;  %p260_p4 = scmp.lt.s32.totalorder (!%p215_p3), %s600_s18, 1  ;;  %vm314_vm1 = vcmask (!%p215_p3), 261120  }
   0x7   : > { %218 = sbr.rel (%p215_p3) target bundleno = 356 (0x164), region = 32  ;;  %548 = vmatprep.subr.bf16.mxu0 (!%p215_p3), %v610_v1  ;;  %552 = vmatprep.mubr.msk.bf16.mxu0 (!%p215_p3), %vm611_vm0, %v610_v1  ;;  %v537_v5 = vld [vmem:[%s694_s2] ss:$0 sm:$0xff] (!%p215_p3)  ;;  %vm359_vm2 = vcmask (!%p215_p3), 257024   ;;  %s612_s11 = smov (!%p215_p3), 96  }
   0x8   : > { %549 = vmatpush3.bf16.msra.mxu0 (!%p215_p3), %v584_v0  ;;  %s613_s12 = smov (!%p215_p3), 64  }
   0x9   : > { %550 = vmatprep.subr.bf16.mxu0 (!%p215_p3), %v610_v1 }
   0xc   : > { %551 = vmatpush3.bf16.msra.mxu0 (!%p215_p3), %v585_v2 }
   0xe   : > { %s703_s18 = smov (!%p260_p4, %s600_s18), 1 }
   0xf   : > { %s533_s26 = sshll.u32 %s703_s18, 3  ;;  %s534_s7 = sshll.u32 %s703_s18, 2 }
  0x10   : > { %s266_s29 = scalar_lea.vmem %s692_s0, %s533_s26  ;;  %s273_s10 = scalar_lea.vmem %s695_s3, %s534_s7 }
  0x11   : > { %v289_v3 = vld [vmem:[%s266_s29] sm:$0xff]  ;;  %s280_s15 = scalar_lea.vmem %s696_s4, %s534_s7  ;;  %s287_s18 = scalar_lea.vmem %s697_s5, %s534_s7 }
  0x12   : > { %v290_v4 = vpack.c.bf16 %v289_v3, %v289_v3 }
  0x14   : > { %553 = vmatmul.mubr.msk.bf16.vlgmr.msra.gmra.mrb[0].mxu0 %vm314_vm1, %v290_v4 }
  0xe7   : > { %v352_v6 = vpop.f32.mrb[0].mxu0 }
  0xe8   : > { %v353_v7 = vadd.f32 %v537_v5, %v352_v6  ;;  %v554_v8 = vpop.f32.mrb[1].mxu0 }
  0xe9   : > { %v355_v9 = vpop.f32.mrb[2].mxu0 }
  0xea   : > { %v358_v10 = vpack.c.bf16 %v353_v7, %v353_v7  ;;  %v555_v11 = vpop.f32.mrb[3].mxu0 }
  0xec   : > { %364 = vrot.lane.b32.xlu0 %v358_v10, %s612_s11  ;;  %360 = vst.msk [vmem:[%s273_s10] sm:$0xf] %vm359_vm2, %v358_v10 }
  0xf0   : > { %368 = vrot.lane.b32.xlu0 %v358_v10, %s613_s12 }
 0x15e   : > { %v365_v12 = vpop.permute.xlu0 %364 }
 0x15f   : > { %367 = vst.msk [vmem:[%s280_s15] sm:$0xf] %vm359_vm2, %v365_v12 }
 0x162   : > { %v369_v13 = vpop.permute.xlu0 %368 }
 0x163   : > { %371 = vst.msk [vmem:[%s287_s18] sm:$0xf] %vm359_vm2, %v369_v13 }
 0x164 PF: > { %s16_s20 = sadd.s32 1, %s608_s20   ;;  %s698_s18 = smov %s604_s19 }
 0x165   : > { %p13_p5 = scmp.ge.s32.totalorder %s16_s20, 4   ;;  %s699_s19 = smov %s701_s21 }
 0x167   :  { %15 = sbr.rel (!%p13_p5) target bundleno = 2 (0x2), region = 86 }

// kernel: transformer_encoder_layer.3
= control target key start
LH: loop header
LB: loop body
LE: loop exit
PB: predicated region body
PF: predicated region fallthrough
CT: control target
= control target key end

     0   :  { %s1981_s29 = smov 0   ;;  %s1983_s30 = smov 0   ;;  %s2246_s0 = inlined_call_operand.vmem [shape: f32[2,8,32], index: 0, kind: input, shape index: {}]   ;;  %s2247_s1 = inlined_call_operand.vmem [shape: bf16[2,8,32], index: 1, kind: input, shape index: {}]   ;;  %s2248_s2 = inlined_call_operand.vmem [shape: bf16[2,8,32], index: 2, kind: input, shape index: {}]   ;;  %s2249_s3 = inlined_call_operand.vmem [shape: bf16[2,8,32], index: 3, kind: input, shape index: {}]   ;;  %s2250_s4 = inlined_call_operand.vmem [shape: bf16[32,32], index: 4, kind: input, shape index: {}]   ;;  %s2251_s5 = inlined_call_operand.vmem [shape: f32[1,32], index: 5, kind: input, shape index: {}]   ;;  %s2252_s6 = inlined_call_operand.vmem [shape: bf16[32,64], index: 6, kind: input, shape index: {}]   ;;  %s2253_s7 = inlined_call_operand.vmem [shape: f32[1,64], index: 7, kind: input, shape index: {}]   ;;  %s2254_s8 = inlined_call_operand.vmem [shape: bf16[64,32], index: 8, kind: input, shape index: {}]   ;;  %s2255_s9 = inlined_call_operand.vmem [shape: f32[1,32], index: 9, kind: input, shape index: {}]   ;;  %s2256_s10 = inlined_call_operand.vmem [shape: f32[1,32], index: 10, kind: input, shape index: {}]   ;;  %s2257_s11 = inlined_call_operand.vmem [shape: f32[1,32], index: 11, kind: input, shape index: {}]   ;;  %s2258_s12 = inlined_call_operand.vmem [shape: f32[1,32], index: 12, kind: input, shape index: {}]   ;;  %s2259_s13 = inlined_call_operand.vmem [shape: f32[1,32], index: 13, kind: input, shape index: {}]   ;;  %s2260_s14 = inlined_call_operand.vmem [shape: f32[2,8,32], index: 14, kind: output, shape index: {}]  }
   0x1   :  { %s1985_s15 = smov 0  }
   0x2 LB: > { %s43_s16 = sadd.s32 1, %s1890_s30  ;;  %p1645_p0 = scmp.ge.s32.totalorder %s1894_s15, 1  ;;  %s1894_s15 = sphi %s1985_s15, %s24_s15   ;;  %s1890_s30 = sphi %s1983_s30, %s2262_s30   ;;  %s1886_s29 = sphi %s1981_s29, %s2261_s29  }
   0x3   : > { %p45_p1 = scmp.ge.s32.totalorder %s43_s16, 2  ;;  %p479_p2 = scmp.lt.s32.totalorder %s1894_s15, 3 }
   0x5   : > { %s2264_s16 = smov (%p45_p1, %s43_s16), 0  ;;  %p480_p3 = pnand %p1645_p0, %p479_p2 }
   0x6   : > { %p550_p4 = scmp.lt.s32.totalorder (!%p480_p3), %s1886_s29, 1  ;;  %vm599_vm0 = vcmask (!%p480_p3), 64512   ;;  %v1896_v0 = vmov (!%p480_p3), 0.0   ;;  %vm1897_vm1 = vmmov (!%p480_p3), 0   ;;  %s1898_s24 = smov (!%p480_p3), 120   ;;  %vm590_vm2 = vcmask (!%p480_p3), 7168  }
   0x7   : > { %483 = sbr.rel (%p480_p3) target bundleno = 2349 (0x92d), region = 76  ;;  %1715 = vmatprep.subr.bf16.mxu0 (!%p480_p3), %v1896_v0  ;;  %600 = vst.msk [vmem:[#allocation4] sm:$0xff] (!%p480_p3), %vm599_vm0, %v1896_v0  ;;  %601 = vst.msk [vmem:[#allocation4 + $0x8] sm:$0xff] (!%p480_p3), %vm599_vm0, %v1896_v0  ;;  %1717 = vmatprep.mubr.msk.bf16.mxu0 (!%p480_p3), %vm1897_vm1, %v1896_v0  ;;  %s1899_s25 = smov (!%p480_p3), 112   ;;  %v1901_v24 = vmov (!%p480_p3), -inf   ;;  %v1902_v25 = vmov (!%p480_p3), 0  }
   0x8   : > { %602 = vst.msk [vmem:[#allocation4 + $0x10] sm:$0xff] (!%p480_p3), %vm599_vm0, %v1896_v0  ;;  %603 = vst.msk [vmem:[#allocation4 + $0x18] sm:$0xff] (!%p480_p3), %vm599_vm0, %v1896_v0  ;;  %1727 = vmatprep.subr.bf16.mxu1 (!%p480_p3), %v1896_v0  ;;  %1729 = vmatprep.mubr.msk.bf16.mxu1 (!%p480_p3), %vm1897_vm1, %v1896_v0  ;;  %s1900_s26 = smov (!%p480_p3), 104   ;;  %vm689_vm3 = vcmask (!%p480_p3), 1043456   ;;  %s1903_s22 = smov (!%p480_p3), 8   ;;  %vm1232_vm4 = vcmask (!%p480_p3), 130048  }
   0x9   : > { %591 = vst.msk [vmem:[#allocation2] sm:$0xff] (!%p480_p3), %vm590_vm2, %v1901_v24  ;;  %592 = vst.msk [vmem:[#allocation2 + $0x8] sm:$0xff] (!%p480_p3), %vm590_vm2, %v1901_v24  ;;  %1825 = vset.pattern.permute.xlu1 (!%p480_p3), %v1902_v25  ;;  %1826 = vset.pattern.permute.xlu0 (!%p480_p3), %v1902_v25  ;;  %vm1235_vm5 = vcmask (!%p480_p3), 195584   ;;  %vm1261_vm6 = vcmask (!%p480_p3), 261120   ;;  %vm1444_vm7 = vcmask (!%p480_p3), 523264  }
   0xa   : > { %593 = vst.msk [vmem:[#allocation2 + $0x10] sm:$0xff] (!%p480_p3), %vm590_vm2, %v1901_v24  ;;  %594 = vst.msk [vmem:[#allocation2 + $0x18] sm:$0xff] (!%p480_p3), %vm590_vm2, %v1901_v24 }
   0xb   : > { %595 = vst.msk [vmem:[#allocation3] sm:$0xff] (!%p480_p3), %vm590_vm2, %v1896_v0  ;;  %596 = vst.msk [vmem:[#allocation3 + $0x8] sm:$0xff] (!%p480_p3), %vm590_vm2, %v1896_v0 }
   0xc   : > { %597 = vst.msk [vmem:[#allocation3 + $0x10] sm:$0xff] (!%p480_p3), %vm590_vm2, %v1896_v0  ;;  %598 = vst.msk [vmem:[#allocation3 + $0x18] sm:$0xff] (!%p480_p3), %vm590_vm2, %v1896_v0 }
   0xe   : > { %s2266_s29 = smov (!%p550_p4, %s1886_s29), 1 }
   0xf   : > { %s2016_s17 = sshll.u32 %s2266_s29, 2 }
  0x10   : > { %s570_s20 = scalar_lea.vmem %s2248_s2, %s2016_s17  ;;  %s563_s23 = scalar_lea.vmem %s2247_s1, %s2016_s17  ;;  %v2077_v41 = vld [vmem:[#allocation2] sm:$0xff]  ;;  %v2096_v47 = vld [vmem:[#allocation2 + $0x8] sm:$0xff] }
  0x11   : > { %v605_v1 = vld [vmem:[%s570_s20] sm:$0xf]  ;;  %s2091_s18 = scalar_lea.vmem %s2249_s3, %s2016_s17  ;;  %v2106_v51 = vld [vmem:[#allocation2 + $0x10] sm:$0xff]  ;;  %v1090_v56 = vld [vmem:[#allocation2 + $0x18] sm:$0xff] }
  0x12   : > { %v1827_v2 = vld [vmem:[%s570_s20] ss:$0 sps:$4 sm:$0xff]   ;;  %v612_v3 = vsel %vm599_vm0, %v605_v1, 0 }
  0x13   : > { %1716 = vmatpush3.bf16.xpose.msra.mxu0 %v612_v3  ;;  %747 = vrot.lane.b32.xlu0 %v1827_v2, %s1898_s24  ;;  %v1828_v4 = vld [vmem:[%s570_s20] ss:$0 sps:$4 sm:$0xff]  }
  0x14   : > { %v1829_v5 = vld [vmem:[%s563_s23] ss:$0 sps:$4 sm:$0xff]   ;;  %1721 = vmatprep.subr.bf16.mxu0 %v1896_v0  ;;  %894 = vrot.lane.b32.xlu1 %v1828_v4, %s1899_s25 }
  0x15   : > { %v1830_v6 = vld [vmem:[%s563_s23] ss:$0 sps:$4 sm:$0xff]  }
  0x16   : > { %v604_v7 = vld [vmem:[%s563_s23] sm:$0xf] }
  0x17   : > { %742 = vrot.lane.b32.xlu0 %v1829_v5, %s1898_s24  ;;  %v1831_v8 = vld [vmem:[%s570_s20] ss:$0 sps:$4 sm:$0xff]  }
  0x18   : > { %889 = vrot.lane.b32.xlu1 %v1830_v6, %s1899_s25  ;;  %v1832_v9 = vld [vmem:[%s563_s23] ss:$0 sps:$4 sm:$0xff]   ;;  %s1904_s23 = smov 16  }
  0x19   : > { %v606_v45 = vld [vmem:[%s2091_s18] sm:$0xf] }
  0x1a   : > { %1718 = vmatmul.mubr.msk.bf16.vlgmr.msra.gmra.mrb[0].mxu0 %vm599_vm0, %v604_v7  ;;  %v691_v46 = vsel %vm689_vm3, %v606_v45, 0  ;;  %v1833_v62 = vld [vmem:[%s2091_s18] ss:$0 sps:$4 sm:$0xff]  }
  0x1b   : > { %1041 = vrot.lane.b32.xlu0 %v1831_v8, %s1900_s26  ;;  %1723 = vmatprep.mubr.msk.bf16.mxu0 %vm1897_vm1, %v1896_v0  ;;  %v1834_v63 = vld [vmem:[%s2091_s18] ss:$0 sps:$4 sm:$0xff]  }
  0x1c   : > { %1036 = vrot.lane.b32.xlu1 %v1832_v9, %s1900_s26  ;;  %1722 = vmatpush3.bf16.msra.mxu0 %v691_v46  ;;  %v1835_v1 = vld [vmem:[%s2091_s18] ss:$0 sps:$4 sm:$0xff]  }
  0x1d   : > { %1733 = vmatprep.subr.bf16.mxu0 %v1896_v0 }
  0x85   : > { %v748_v10 = vpop.permute.xlu0 %747 }
  0x86   : > { %v753_v11 = vsel %vm599_vm0, %v748_v10, 0  ;;  %v895_v12 = vpop.permute.xlu1 %894 }
  0x87   : > { %1728 = vmatpush3.bf16.xpose.msra.mxu1 %v753_v11  ;;  %v900_v14 = vsel %vm599_vm0, %v895_v12, 0 }
  0x88   : > { %1739 = vmatprep.subr.bf16.mxu1 %v1896_v0 }
  0x89   : > { %v743_v13 = vpop.permute.xlu0 %742 }
  0x8a   : > { %v890_v16 = vpop.permute.xlu1 %889 }
  0x8d   : > { %v1042_v15 = vpop.permute.xlu0 %1041 }
  0x8e   : > { %1730 = vmatmul.mubr.msk.bf16.vlgmr.msra.gmra.mrb[0].mxu1 %vm599_vm0, %v743_v13  ;;  %v1047_v17 = vsel %vm599_vm0, %v1042_v15, 0  ;;  %v1037_v18 = vpop.permute.xlu1 %1036 }
  0x8f   : > { %1740 = vmatpush3.bf16.xpose.msra.mxu1 %v900_v14  ;;  %1741 = vmatprep.mubr.msk.bf16.mxu1 %vm1897_vm1, %v1896_v0 }
  0x90   : > { %1751 = vmatprep.subr.bf16.mxu1 %v1896_v0 }
  0x96   : > { %1742 = vmatmul.mubr.msk.bf16.vlgmr.msra.gmra.mrb[4].mxu1 %vm599_vm0, %v890_v16 }
  0x97   : > { %1752 = vmatpush3.bf16.xpose.msra.mxu1 %v1047_v17  ;;  %1753 = vmatprep.mubr.msk.bf16.mxu1 %vm1897_vm1, %v1896_v0 }
  0x98   : > { %1763 = vmatprep.subr.bf16.mxu1 %v1896_v0 }
  0x9e   : > { %1754 = vmatmul.mubr.msk.bf16.vlgmr.msra.gmra.mrb[8].mxu1 %vm599_vm0, %v1037_v18 }
  0x9f   : > { %1767 = vmatprep.mubr.msk.bf16.mxu1 %vm1897_vm1, %v1896_v0 }
  0xed   : > { %v2052_v19 = vpop.f32.mrb[0].mxu0 }
  0xee   : > { %v655_v20 = vsel %vm599_vm0, %v2052_v19, -inf  ;;  %v1719_v21 = vpop.f32.mrb[1].mxu0 }
  0xef   : > { %656 = vmax.xlane.f32.xlu0 %v655_v20  ;;  %v651_v22 = vpop.f32.mrb[2].mxu0 }
  0xf0   : > { %v1720_v23 = vpop.f32.mrb[3].mxu0 }
 0x161   : > { %v2068_v26 = vpop.f32.mrb[0].mxu1 }
 0x162   : > { %v1731_v27 = vpop.f32.mrb[1].mxu1  ;;  %v797_v28 = vsel %vm599_vm0, %v2068_v26, -inf }
 0x163   : > { %798 = vmax.xlane.f32.xlu1 %v797_v28  ;;  %v792_v29 = vpop.f32.mrb[2].mxu1 }
 0x164   : > { %v1732_v30 = vpop.f32.mrb[3].mxu1 }
 0x169   : > { %v936_v31 = vpop.f32.mrb[4].mxu1 }
 0x16a   : > { %v1743_v32 = vpop.f32.mrb[5].mxu1  ;;  %v944_v33 = vsel %vm599_vm0, %v936_v31, -inf }
 0x16b   : > { %v939_v34 = vpop.f32.mrb[6].mxu1  ;;  %945 = vmax.xlane.f32.xlu0 %v944_v33 }
 0x16c   : > { %v1744_v35 = vpop.f32.mrb[7].mxu1 }
 0x171   : > { %v2073_v36 = vpop.f32.mrb[8].mxu1 }
 0x172   : > { %v1755_v37 = vpop.f32.mrb[9].mxu1  ;;  %v1091_v38 = vsel %vm599_vm0, %v2073_v36, -inf }
 0x173   : > { %v1086_v39 = vpop.f32.mrb[10].mxu1  ;;  %1092 = vmax.xlane.f32.xlu0 %v1091_v38 }
 0x174   : > { %v1756_v40 = vpop.f32.mrb[11].mxu1  ;;  %v813_v39 = vld [vmem:[#allocation3 + $0x8] sm:$0xff] }
 0x17c   : > { %v657_v42 = vpop.xlane.xlu0 %656 }
 0x17d   : > { %v2080_v43 = vmax.f32 %v2077_v41, %v657_v42 }
 0x17f   : > { %v659_v44 = vsub.f32 %v2077_v41, %v2080_v43  ;;  %735 = vst.msk [vmem:[#allocation2] sm:$0xff] %vm590_vm2, %v2080_v43  ;;  %664 = vperm.xlu1 %1825, %v2080_v43  }
 0x181   : > { %v660_v46 = vmul.f32 1.442695, %v659_v44 }
 0x1f0   : > { %v799_v48 = vpop.xlane.xlu1 %798 }
 0x1f1   : > { %v2099_v49 = vmax.f32 %v2096_v47, %v799_v48 }
 0x1f3   : > { %v801_v50 = vsub.f32 %v2096_v47, %v2099_v49  ;;  %882 = vst.msk [vmem:[#allocation2 + $0x8] sm:$0xff] %vm590_vm2, %v2099_v49  ;;  %806 = vperm.xlu0 %1826, %v2099_v49   ;;  %v960_v47 = vld [vmem:[#allocation3 + $0x10] sm:$0xff] }
 0x1f8   : > { %v946_v52 = vpop.xlane.xlu0 %945 }
 0x1f9   : > { %v2109_v53 = vmax.f32 %v2106_v51, %v946_v52  ;;  %v1107_v52 = vld [vmem:[#allocation3 + $0x18] sm:$0xff] }
 0x1fb   : > { %v948_v54 = vsub.f32 %v2106_v51, %v2109_v53  ;;  %1029 = vst.msk [vmem:[#allocation2 + $0x10] sm:$0xff] %vm590_vm2, %v2109_v53  ;;  %953 = vperm.xlu1 %1825, %v2109_v53  }
 0x1fd   : > { %v949_v30 = vmul.f32 1.442695, %v948_v54 }
 0x1fe   : > { %v665_v55 = vpop.permute.xlu1 %664 }
 0x1ff   : > { %v667_v57 = vsub.f32 %v2052_v19, %v665_v55 }
 0x200   : > { %v1093_v58 = vpop.xlane.xlu0 %1092 }
 0x201   : > { %v668_v59 = vmul.f32 1.442695, %v667_v57  ;;  %v1094_v60 = vmax.f32 %v1090_v56, %v1093_v58 }
 0x203   : > { %1844 = vpow2.f32 %v668_v59  ;;  %v1095_v61 = vsub.f32 %v1090_v56, %v1094_v60  ;;  %1176 = vst.msk [vmem:[#allocation2 + $0x18] sm:$0xff] %vm590_vm2, %v1094_v60  ;;  %1100 = vperm.xlu1 %1825, %v1094_v60   ;;  %v670_v56 = vld [vmem:[#allocation3] sm:$0xff] }
 0x205   : > { %v1096_v28 = vmul.f32 1.442695, %v1095_v61  ;;  %v821_v61 = vld [vmem:[#allocation4 + $0x8] sm:$0xff] }
 0x207   : > { %832 = vrot.lane.b32.xlu1 %v1833_v62, %s1898_s24  ;;  %s1905_s24 = smov 24  }
 0x20b   : > { %979 = vrot.lane.b32.xlu1 %v1834_v63, %s1899_s25  ;;  %s1646_s25 = sshll.u32 %s2266_s29, 3 }
 0x20c   : > { %s556_s28 = scalar_lea.vmem %s2246_s0, %s1646_s25 }
 0x20d   : > { %v1845_v2 = vpop.eup %1844 }
 0x20e   : > { %v685_v3 = vpack.c.bf16 %v1845_v2, %v1845_v2  ;;  %v672_v29 = vsel %vm599_vm0, %v1845_v2, 0.0 }
 0x20f   : > { %1126 = vrot.lane.b32.xlu1 %v1835_v1, %s1900_s26 }
 0x210   : > { %1724 = vmatmul.mubr.msk.bf16.vlgmr.msra.gmra.mrb[4].mxu0 %vm599_vm0, %v685_v3 }
 0x211   : > { %1735 = vmatprep.mubr.msk.bf16.mxu0 %vm1897_vm1, %v1896_v0 }
 0x272   : > { %v807_v4 = vpop.permute.xlu0 %806 }
 0x273   : > { %v809_v5 = vsub.f32 %v2068_v26, %v807_v4  ;;  %v802_v26 = vmul.f32 1.442695, %v801_v50 }
 0x275   : > { %v810_v6 = vmul.f32 1.442695, %v809_v5 }
 0x277   : > { %1846 = vpow2.f32 %v810_v6  ;;  %v968_v6 = vld [vmem:[#allocation4 + $0x10] sm:$0xff] }
 0x27a   : > { %v954_v7 = vpop.permute.xlu1 %953 }
 0x27b   : > { %v956_v8 = vsub.f32 %v936_v31, %v954_v7 }
 0x27d   : > { %v957_v9 = vmul.f32 1.442695, %v956_v8 }
 0x27f   : > { %1848 = vpow2.f32 %v957_v9 }
 0x281   : > { %v1847_v10 = vpop.eup %1846 }
 0x282   : > { %v1101_v11 = vpop.permute.xlu1 %1100  ;;  %v815_v12 = vsel %vm599_vm0, %v1847_v10, 0.0  ;;  %v828_v18 = vpack.c.bf16 %v1847_v10, %v1847_v10 }
 0x283   : > { %v1103_v13 = vsub.f32 %v2073_v36, %v1101_v11  ;;  %816 = vadd.xlane.f32.xlu1 %v815_v12 }
 0x285   : > { %v1104_v14 = vmul.f32 1.442695, %v1103_v13 }
 0x286   : > { %v833_v15 = vpop.permute.xlu1 %832 }
 0x287   : > { %1850 = vpow2.f32 %v1104_v14  ;;  %v838_v16 = vsel %vm689_vm3, %v833_v15, 0  ;;  %v1115_v14 = vld [vmem:[#allocation4 + $0x18] sm:$0xff] }
 0x288   : > { %1734 = vmatpush3.bf16.msra.mxu0 %v838_v16  ;;  %1852 = vpow2.f32 %v802_v26 }
 0x289   : > { %v1849_v17 = vpop.eup %1848  ;;  %1745 = vmatprep.subr.bf16.mxu0 %v1896_v0  ;;  %1854 = vpow2.f32 %v1096_v28 }
 0x28a   : > { %v962_v19 = vsel %vm599_vm0, %v1849_v17, 0.0  ;;  %v980_v20 = vpop.permute.xlu1 %979  ;;  %v975_v24 = vpack.c.bf16 %v1849_v17, %v1849_v17  ;;  %1856 = vpow2.f32 %v949_v30 }
 0x28b   : > { %963 = vadd.xlane.f32.xlu0 %v962_v19  ;;  %1736 = vmatmul.mubr.msk.bf16.vlgmr.msra.gmra.mrb[8].mxu0 %vm599_vm0, %v828_v18  ;;  %v985_v21 = vsel %vm689_vm3, %v980_v20, 0  ;;  %1858 = vpow2.f32 %v660_v46 }
 0x28c   : > { %1746 = vmatpush3.bf16.msra.mxu0 %v985_v21  ;;  %1747 = vmatprep.mubr.msk.bf16.mxu0 %vm1897_vm1, %v1896_v0 }
 0x28d   : > { %1757 = vmatprep.subr.bf16.mxu0 %v1896_v0 }
 0x28e   : > { %v1127_v22 = vpop.permute.xlu1 %1126 }
 0x28f   : > { %v1132_v25 = vsel %vm689_vm3, %v1127_v22, 0 }
 0x291   : > { %v1851_v23 = vpop.eup %1850 }
 0x292   : > { %v1109_v27 = vsel %vm599_vm0, %v1851_v23, 0.0  ;;  %v1122_v31 = vpack.c.bf16 %v1851_v23, %v1851_v23  ;;  %v1853_v32 = vpop.eup %1852 }
 0x293   : > { %1748 = vmatmul.mubr.msk.bf16.vlgmr.msra.gmra.mrb[12].mxu0 %vm599_vm0, %v975_v24  ;;  %1110 = vadd.xlane.f32.xlu1 %v1109_v27  ;;  %v1855_v33 = vpop.eup %1854  ;;  %v814_v40 = vmul.f32 %v1853_v32, %v813_v39  ;;  %v678_v24 = vld [vmem:[#allocation4] sm:$0xff] }
 0x294   : > { %1758 = vmatpush3.bf16.msra.mxu0 %v1132_v25  ;;  %1759 = vmatprep.mubr.msk.bf16.mxu0 %vm1897_vm1, %v1896_v0  ;;  %v1857_v34 = vpop.eup %1856  ;;  %v1108_v53 = vmul.f32 %v1855_v33, %v1107_v52  ;;  %v1836_v27 = vld [vmem:[%s2250_s4] sm:$0xff]  }
 0x295   : > { %1771 = vmatprep.subr.bf16.mxu0 %v1896_v0  ;;  %v961_v48 = vmul.f32 %v1857_v34, %v960_v47  ;;  %v1859_v54 = vpop.eup %1858  ;;  %1764 = vmatpush3.bf16.msra.mxu1 %v1836_v27 }
 0x296   : > { %v671_v41 = vmul.f32 %v1859_v54, %v670_v56  ;;  %1765 = vmatprep.subr.bf16.mxu1 %v1896_v0 }
 0x297   : > { %673 = vadd.xlane.f32.xlu1 %v672_v29 }
 0x29b   : > { %1760 = vmatmul.mubr.msk.bf16.vlgmr.msra.gmra.mrb[16].mxu0 %vm599_vm0, %v1122_v31  ;;  %v1837_v31 = vld [vmem:[%s2250_s4 + $0x8] sm:$0xff]  }
 0x29c   : > { %1775 = vmatprep.mubr.msk.bf16.mxu0 %vm1897_vm1, %v1896_v0  ;;  %1766 = vmatpush3.bf16.msra.mxu1 %v1837_v31 }
 0x29d   : > { %1779 = vmatprep.subr.bf16.mxu1 %v1896_v0 }
 0x2a1   : > { %824 = vperm.xlu0 %1826, %v1853_v32  }
 0x2a5   : > { %1118 = vperm.xlu0 %1826, %v1855_v33  }
 0x2a8   : > { %971 = vperm.xlu1 %1825, %v1857_v34  }
 0x2e3   : > { %v2151_v35 = vpop.f32.mrb[4].mxu0 }
 0x2e4   : > { %v1725_v36 = vpop.f32.mrb[5].mxu0 }
 0x2e5   : > { %v730_v37 = vpop.f32.mrb[6].mxu0 }
 0x2e6   : > { %v1726_v38 = vpop.f32.mrb[7].mxu0 }
 0x310   : > { %v817_v42 = vpop.xlane.xlu1 %816 }
 0x311   : > { %v818_v45 = vadd.f32 %v817_v42, %v814_v40 }
 0x313   : > { %819 = vst.msk [vmem:[#allocation3 + $0x8] sm:$0xff] %vm590_vm2, %v818_v45 }
 0x318   : > { %v964_v49 = vpop.xlane.xlu0 %963 }
 0x319   : > { %v965_v50 = vadd.f32 %v964_v49, %v961_v48 }
 0x31a   : > { %v1191_v51 = vld [vmem:[#allocation3 + $0x8] sm:$0xff] }
 0x31b   : > { %966 = vst.msk [vmem:[#allocation3 + $0x10] sm:$0xff] %vm590_vm2, %v965_v50  ;;  %1194 = vperm.xlu1 %1825, %v1191_v51  }
 0x320   : > { %v1111_v55 = vpop.xlane.xlu1 %1110  ;;  %v825_v62 = vpop.permute.xlu0 %824 }
 0x321   : > { %v1112_v57 = vadd.f32 %v1111_v55, %v1108_v53  ;;  %v827_v63 = vmul.f32 %v825_v62, %v821_v61 }
 0x322   : > { %v1201_v58 = vld [vmem:[#allocation3 + $0x10] sm:$0xff] }
 0x323   : > { %1113 = vst.msk [vmem:[#allocation3 + $0x18] sm:$0xff] %vm590_vm2, %v1112_v57  ;;  %1204 = vperm.xlu1 %1825, %v1201_v58   ;;  %v1668_v57 = vld [vmem:[%s2251_s5] ss:$0 sm:$0xff] }
 0x324   : > { %v674_v43 = vpop.xlane.xlu1 %673  ;;  %v1119_v15 = vpop.permute.xlu0 %1118 }
 0x325   : > { %v675_v44 = vadd.f32 %v674_v43, %v671_v41  ;;  %v1121_v16 = vmul.f32 %v1119_v15, %v1115_v14  ;;  %v1304_v41 = vld [vmem:[%s556_s28] sm:$0xff] }
 0x326   : > { %v1673_v15 = vld [vmem:[%s2257_s11] ss:$0 sm:$0xff] }
 0x327   : > { %677 = vst.msk [vmem:[#allocation3] sm:$0xff] %vm590_vm2, %v675_v44  ;;  %681 = vperm.xlu1 %1825, %v1859_v54  }
 0x328   : > { %v972_v7 = vpop.permute.xlu1 %971 }
 0x329   : > { %v974_v8 = vmul.f32 %v972_v7, %v968_v6  ;;  %v1839_v6 = vld [vmem:[%s2252_s6 + $0x8] sm:$0xff]   ;;  %v1840_v7 = vld [vmem:[%s2254_s8] sm:$0xff]  }
 0x32a   : > { %v1211_v59 = vld [vmem:[#allocation3 + $0x18] sm:$0xff] }
 0x32b   : > { %1214 = vperm.xlu0 %1826, %v1211_v59  }
 0x32e   : > { %v1181_v60 = vld [vmem:[#allocation3] sm:$0xff] }
 0x32f   : > { %1184 = vperm.xlu0 %1826, %v1181_v60  }
 0x35e   : > { %v874_v1 = vpop.f32.mrb[8].mxu0 }
 0x35f   : > { %v880_v2 = vadd.f32 %v874_v1, %v827_v63  ;;  %v1737_v3 = vpop.f32.mrb[9].mxu0 }
 0x360   : > { %v877_v4 = vpop.f32.mrb[10].mxu0 }
 0x361   : > { %881 = vst.msk [vmem:[#allocation4 + $0x8] sm:$0xff] %vm599_vm0, %v880_v2  ;;  %v1738_v5 = vpop.f32.mrb[11].mxu0 }
 0x362   : > { %v1838_v5 = vld [vmem:[%s2252_s6] sm:$0xff]  }
 0x363   : > { %1772 = vmatpush3.bf16.msra.mxu0 %v1838_v5 }
 0x364   : > { %1773 = vmatprep.subr.bf16.mxu0 %v1896_v0 }
 0x366   : > { %v1021_v9 = vpop.f32.mrb[12].mxu0 }
 0x367   : > { %v1027_v10 = vadd.f32 %v1021_v9, %v974_v8  ;;  %v1749_v11 = vpop.f32.mrb[13].mxu0  ;;  %1774 = vmatpush3.bf16.msra.mxu0 %v1839_v6  ;;  %v1841_v8 = vld [vmem:[%s2254_s8 + $0x8] sm:$0xff]  }
 0x368   : > { %v1024_v12 = vpop.f32.mrb[14].mxu0  ;;  %v1190_v26 = vld [vmem:[#allocation4 + $0x8] sm:$0xff] }
 0x369   : > { %1028 = vst.msk [vmem:[#allocation4 + $0x10] sm:$0xff] %vm599_vm0, %v1027_v10  ;;  %v1750_v13 = vpop.f32.mrb[15].mxu0 }
 0x36a   : > { %v1672_v13 = vld [vmem:[%s2256_s10] ss:$0 sm:$0xff] }
 0x36e   : > { %v1168_v17 = vpop.f32.mrb[16].mxu0 }
 0x36f   : > { %v1174_v18 = vadd.f32 %v1168_v17, %v1121_v16  ;;  %v1761_v19 = vpop.f32.mrb[17].mxu0 }
 0x370   : > { %v1171_v20 = vpop.f32.mrb[18].mxu0  ;;  %v1200_v37 = vld [vmem:[#allocation4 + $0x10] sm:$0xff] }
 0x371   : > { %1175 = vst.msk [vmem:[#allocation4 + $0x18] sm:$0xff] %vm599_vm0, %v1174_v18  ;;  %v1762_v21 = vpop.f32.mrb[19].mxu0  ;;  %v1842_v19 = vld [vmem:[%s2254_s8 + $0x10] sm:$0xff]   ;;  %v1843_v20 = vld [vmem:[%s2254_s8 + $0x18] sm:$0xff]  }
 0x372   : > { %v1674_v21 = vld [vmem:[%s2253_s7] ss:$0 sm:$0xff] }
 0x378   : > { %v1210_v42 = vld [vmem:[#allocation4 + $0x18] sm:$0xff] }
 0x39a   : > { %v1195_v22 = vpop.permute.xlu1 %1194 }
 0x39b   : > { %1860 = vrcp.f32 %v1195_v22 }
 0x3a2   : > { %v1205_v23 = vpop.permute.xlu1 %1204 }
 0x3a3   : > { %1862 = vrcp.f32 %v1205_v23 }
 0x3a5   : > { %v1861_v25 = vpop.eup %1860 }
 0x3a6   : > { %v682_v28 = vpop.permute.xlu1 %681  ;;  %v1198_v29 = vmul.f32 %v1861_v25, %v1190_v26 }
 0x3a7   : > { %v684_v30 = vmul.f32 %v682_v28, %v678_v24 }
 0x3a8   : > { %v1199_v32 = vpack.c.bf16 %v1198_v29, %v1198_v29 }
 0x3a9   : > { %v733_v33 = vadd.f32 %v2151_v35, %v684_v30 }
 0x3aa   : > { %v1215_v34 = vpop.permute.xlu0 %1214  ;;  %1221 = vrot.lane.b32.xlu1 %v1199_v32, %s1903_s22 }
 0x3ab   : > { %734 = vst.msk [vmem:[#allocation4] sm:$0xff] %vm599_vm0, %v733_v33  ;;  %1864 = vrcp.f32 %v1215_v34 }
 0x3ad   : > { %v1863_v36 = vpop.eup %1862 }
 0x3ae   : > { %v1208_v38 = vmul.f32 %v1863_v36, %v1200_v37  ;;  %v1185_v35 = vpop.permute.xlu0 %1184 }
 0x3af   : > { %1866 = vrcp.f32 %v1185_v35 }
 0x3b0   : > { %v1209_v39 = vpack.c.bf16 %v1208_v38, %v1208_v38 }
 0x3b2   : > { %1224 = vrot.lane.b32.xlu0 %v1209_v39, %s1904_s23  ;;  %v1180_v48 = vld [vmem:[#allocation4] sm:$0xff]  ;;  %s584_s23 = scalar_lea.vmem %s2260_s14, %s1646_s25 }
 0x3b5   : > { %v1865_v40 = vpop.eup %1864 }
 0x3b6   : > { %v1218_v45 = vmul.f32 %v1865_v40, %v1210_v42 }
 0x3b8   : > { %v1219_v46 = vpack.c.bf16 %v1218_v45, %v1218_v45 }
 0x3b9   : > { %v1867_v47 = vpop.eup %1866 }
 0x3ba   : > { %1227 = vrot.lane.b32.xlu1 %v1219_v46, %s1905_s24  ;;  %v1188_v49 = vmul.f32 %v1867_v47, %v1180_v48  ;;  %v1684_v48 = vld [vmem:[%s2258_s12] ss:$0 sm:$0xff] }
 0x3bc   : > { %v1189_v51 = vpack.c.bf16 %v1188_v49, %v1188_v49 }
 0x41c   : > { %v1222_v50 = vpop.permute.xlu1 %1221 }
 0x41d   : > { %v1231_v53 = vsel %vm599_vm0, %v1189_v51, %v1222_v50  ;;  %v1685_v50 = vld [vmem:[%s2259_s13] ss:$0 sm:$0xff] }
 0x424   : > { %v1225_v52 = vpop.permute.xlu0 %1224 }
 0x425   : > { %v1234_v54 = vsel %vm1232_vm4, %v1231_v53, %v1225_v52 }
 0x42c   : > { %v1228_v55 = vpop.permute.xlu1 %1227 }
 0x42d   : > { %v1237_v56 = vsel %vm1235_vm5, %v1234_v54, %v1228_v55 }
 0x42e   : > { %1768 = vmatmul.mubr.msk.bf16.vlgmr.msra.gmra.mrb[12].mxu1 %vm1261_vm6, %v1237_v56 }
 0x42f   : > { %1787 = vmatprep.mubr.msk.bf16.mxu1 %vm1897_vm1, %v1896_v0  ;;  %1780 = vmatpush3.bf16.msra.mxu1 %v1840_v7 }
 0x430   : > { %1781 = vmatprep.subr.bf16.mxu1 %v1896_v0 }
 0x433   : > { %1782 = vmatpush3.bf16.msra.mxu1 %v1841_v8 }
 0x434   : > { %1783 = vmatprep.subr.bf16.mxu1 %v1896_v0 }
 0x437   : > { %1784 = vmatpush3.bf16.msra.mxu1 %v1842_v19 }
 0x438   : > { %1785 = vmatprep.subr.bf16.mxu1 %v1896_v0  ;;  %v1678_v0 = vld [vmem:[%s2255_s9] ss:$0 sm:$0xff] }
 0x43b   : > { %1786 = vmatpush3.bf16.msra.mxu1 %v1843_v20 }
 0x501   : > { %v1298_v58 = vpop.f32.mrb[12].mxu1 }
 0x502   : > { %v1299_v43 = vadd.f32 %v1668_v57, %v1298_v58  ;;  %v1769_v44 = vpop.f32.mrb[13].mxu1 }
 0x503   : > { %v1301_v59 = vpop.f32.mrb[14].mxu1 }
 0x504   : > { %v1770_v60 = vpop.f32.mrb[15].mxu1  ;;  %v1305_v61 = vadd.f32 %v1304_v41, %v1299_v43 }
 0x506   : > { %v1306_v62 = vsel %vm1261_vm6, %v1305_v61, 0.0 }
 0x507   : > { %1307 = vadd.xlane.f32.xlu0 %v1306_v62 }
 0x594   : > { %v1308_v63 = vpop.xlane.xlu0 %1307 }
 0x595   : > { %v1310_v1 = vmul.f32 0.03125, %v1308_v63 }
 0x597   : > { %v1311_v2 = vsub.f32 %v1305_v61, %v1310_v1 }
 0x599   : > { %v1312_v3 = vmul.f32 %v1311_v2, %v1311_v2 }
 0x59b   : > { %v1313_v4 = vsel %vm1261_vm6, %v1312_v3, 0.0 }
 0x59c   : > { %1314 = vadd.xlane.f32.xlu1 %v1313_v4 }
 0x629   : > { %v1315_v9 = vpop.xlane.xlu1 %1314 }
 0x62a   : > { %v1316_v10 = vmul.f32 0.03125, %v1315_v9 }
 0x62c   : > { %v1317_v11 = vadd.f32 1e-05, %v1316_v10 }
 0x62e   : > { %1868 = vrsqrt.f32 %v1317_v11 }
 0x638   : > { %v1869_v12 = vpop.eup %1868 }
 0x639   : > { %v1319_v14 = vmul.f32 %v1869_v12, %v1311_v2 }
 0x63b   : > { %v1327_v16 = vmul.f32 %v1672_v13, %v1319_v14 }
 0x63d   : > { %v1335_v17 = vadd.f32 %v1673_v15, %v1327_v16 }
 0x63f   : > { %v1336_v18 = vpack.c.bf16 %v1335_v17, %v1335_v17 }
 0x641   : > { %1776 = vmatmul.mubr.msk.bf16.vlgmr.msra.gmra.mrb[20].mxu0 %vm1261_vm6, %v1336_v18 }
 0x714   : > { %v1397_v22 = vpop.f32.mrb[20].mxu0 }
 0x715   : > { %v1398_v23 = vadd.f32 %v1674_v21, %v1397_v22  ;;  %v1777_v24 = vpop.f32.mrb[21].mxu0 }
 0x716   : > { %v1400_v25 = vpop.f32.mrb[22].mxu0 }
 0x717   : > { %v1403_v26 = vmax.f32 %v1398_v23, 0.0  ;;  %v1778_v27 = vpop.f32.mrb[23].mxu0 }
 0x719   : > { %v1404_v28 = vpack.c.bf16 %v1403_v26, %v1403_v26 }
 0x71b   : > { %1788 = vmatmul.mubr.msk.bf16.vlgmr.msra.gmra.mrb[16].mxu1 %vm1444_vm7, %v1404_v28 }
 0x7ee   : > { %v1482_v29 = vpop.f32.mrb[16].mxu1 }
 0x7ef   : > { %v1483_v30 = vadd.f32 %v1678_v0, %v1482_v29  ;;  %v1789_v31 = vpop.f32.mrb[17].mxu1 }
 0x7f0   : > { %v1485_v32 = vpop.f32.mrb[18].mxu1 }
 0x7f1   : > { %v1790_v33 = vpop.f32.mrb[19].mxu1  ;;  %v1488_v34 = vadd.f32 %v1483_v30, %v1335_v17 }
 0x7f3   : > { %v1489_v36 = vsel %vm1261_vm6, %v1488_v34, 0.0 }
 0x7f4   : > { %1490 = vadd.xlane.f32.xlu0 %v1489_v36 }
 0x881   : > { %v1491_v37 = vpop.xlane.xlu0 %1490 }
 0x882   : > { %v1492_v38 = vmul.f32 0.03125, %v1491_v37 }
 0x884   : > { %v1493_v39 = vsub.f32 %v1488_v34, %v1492_v38 }
 0x886   : > { %v1494_v40 = vmul.f32 %v1493_v39, %v1493_v39 }
 0x888   : > { %v1495_v42 = vsel %vm1261_vm6, %v1494_v40, 0.0 }
 0x889   : > { %1496 = vadd.xlane.f32.xlu0 %v1495_v42 }
 0x916   : > { %v1497_v45 = vpop.xlane.xlu0 %1496 }
 0x917   : > { %v1498_v46 = vmul.f32 0.03125, %v1497_v45 }
 0x919   : > { %v1499_v35 = vadd.f32 1e-05, %v1498_v46 }
 0x91b   : > { %1870 = vrsqrt.f32 %v1499_v35 }
 0x925   : > { %v1871_v47 = vpop.eup %1870 }
 0x926   : > { %v1501_v49 = vmul.f32 %v1871_v47, %v1493_v39 }
 0x928   : > { %v1509_v51 = vmul.f32 %v1684_v48, %v1501_v49 }
 0x92a   : > { %v1517_v52 = vadd.f32 %v1685_v50, %v1509_v51 }
 0x92c   : > { %1518 = vst.msk [vmem:[%s584_s23] sm:$0xff] %vm1261_vm6, %v1517_v52 }
 0x92d PF: > { %s24_s15 = sadd.s32 1, %s1894_s15   ;;  %s2261_s29 = smov %s1890_s30 }
 0x92e   : > { %p21_p5 = scmp.ge.s32.totalorder %s24_s15, 4   ;;  %s2262_s30 = smov %s2264_s16 }
 0x930   :  { %23 = sbr.rel (!%p21_p5) target bundleno = 2 (0x2), region = 132 }

</bundles_post_ra>
